<compile_context>
chip_gen: v7x
topology: tpu7x:2x2x1
jax: 0.10.0
libtpu: 0.0.40
codegen_flags: <defaults>
</compile_context>

<pallas_src>
import jax
import jax.numpy as jnp
from jax.experimental import pallas as pl
from jax.experimental.pallas import tpu as pltpu


def _round_up(n, m):
    return ((n + m - 1) // m) * m


def decoder_kernel(x_ref, w1_ref, b1_ref, w2_ref, b2_ref, o_ref):
    # x: (bm, 128)   w1: (128, 1024)   w2: (512, 896)
    c_hid_p = w2_ref.shape[0]  # 512 (padded hidden), static at trace time

    x = x_ref[...]

    # Fused GLU: one wide matmul, then lane-aligned split at c_hid_p.
    y1 = jnp.dot(x, w1_ref[...], preferred_element_type=jnp.float32) + b1_ref[...]
    s = jax.nn.sigmoid(y1[:, :c_hid_p])
    g = jnp.maximum(y1[:, c_hid_p:], 0.0)
    h = s * g  # (bm, 512); padded columns are exactly 0 (relu(0) gate)

    # fc2 + sigmoid (padded W2 rows are zero, so padding never leaks in)
    y2 = jnp.dot(h, w2_ref[...], preferred_element_type=jnp.float32) + b2_ref[...]
    o_ref[...] = jax.nn.sigmoid(y2).astype(o_ref.dtype)


def decoder_forward(x, params, *, bm=256):
    """x: [B, 100] f32. params: (ws, bs, wg, bg, w2, b2), weights stored [in, out]."""
    ws, bs, wg, bg, w2, b2 = params
    B, c_in = x.shape
    c_hid = ws.shape[1]
    c_out = w2.shape[1]

    c_in_p = _round_up(c_in, 128)    # 100 -> 128
    c_hid_p = _round_up(c_hid, 128)  # 400 -> 512
    c_out_p = _round_up(c_out, 128)  # 784 -> 896

    f32 = jnp.float32

    # Pack GLU weights/biases: [c_in_p, 2*c_hid_p], split point at c_hid_p (lane-aligned).
    w1 = jnp.zeros((c_in_p, 2 * c_hid_p), f32)
    w1 = w1.at[:c_in, :c_hid].set(ws.astype(f32))
    w1 = w1.at[:c_in, c_hid_p:c_hid_p + c_hid].set(wg.astype(f32))
    b1 = jnp.zeros((1, 2 * c_hid_p), f32)
    b1 = b1.at[:, :c_hid].set(bs.reshape(1, -1).astype(f32))
    b1 = b1.at[:, c_hid_p:c_hid_p + c_hid].set(bg.reshape(1, -1).astype(f32))

    # fc2, padded; rows [c_hid:c_hid_p] stay zero so padded hidden cols contribute nothing.
    w2p = jnp.zeros((c_hid_p, c_out_p), f32).at[:c_hid, :c_out].set(w2.astype(f32))
    b2p = jnp.zeros((1, c_out_p), f32).at[:, :c_out].set(b2.reshape(1, -1).astype(f32))

    # Batch tiling: fat tiles, but never bigger than the (sublane-rounded) batch.
    bm_eff = min(bm, _round_up(B, 8))
    bm_eff = _round_up(bm_eff, 8)
    B_pad = _round_up(B, bm_eff)
    xp = jnp.zeros((B_pad, c_in_p), f32).at[:B, :c_in].set(x.astype(f32))

    full = lambda shape: pl.BlockSpec(shape, lambda i: (0, 0))

    out = pl.pallas_call(
        decoder_kernel,
        out_shape=jax.ShapeDtypeStruct((B_pad, c_out_p), jnp.float32),
        grid_spec=pltpu.PrefetchScalarGridSpec(
            num_scalar_prefetch=0,
            grid=(B_pad // bm_eff,),
            in_specs=[
                pl.BlockSpec((bm_eff, c_in_p), lambda i: (i, 0)),  # x tile
                full((c_in_p, 2 * c_hid_p)),                        # packed W1 (Ws|Wg)
                full((1, 2 * c_hid_p)),                             # packed b1
                full((c_hid_p, c_out_p)),                           # W2 (padded)
                full((1, c_out_p)),                                 # b2 (padded)
            ],
            out_specs=pl.BlockSpec((bm_eff, c_out_p), lambda i: (i, 0)),
        ),
        compiler_params=pltpu.CompilerParams(
            dimension_semantics=("parallel",),
        ),
    )(xp, w1, b1, w2p, b2p)

    return out[:B, :c_out]


def init_params(key):
    """Deterministic init matching PyTorch nn.Linear default (uniform +-1/sqrt(fan_in)).
    Weights are stored as [in, out] (transposed vs. PyTorch's [out, in])."""
    def linear(key, c_in, c_out):
        kw, kb = jax.random.split(key)
        bound = 1.0 / jnp.sqrt(c_in)
        w = jax.random.uniform(kw, (c_in, c_out), jnp.float32, -bound, bound)
        b = jax.random.uniform(kb, (1, c_out), jnp.float32, -bound, bound)
        return w, b

    k1, k2, k3 = jax.random.split(key, 3)
    ws, bs = linear(k1, 100, 400)   # GLU.s
    wg, bg = linear(k2, 100, 400)   # GLU.g
    w2, b2 = linear(k3, 400, 784)   # fc2
    return ws, bs, wg, bg, w2, b2


def decoder_reference(x, params):
    ws, bs, wg, bg, w2, b2 = params
    s = jax.nn.sigmoid(x @ ws + bs)
    g = jnp.maximum(x @ wg + bg, 0.0)
    h = s * g
    return jax.nn.sigmoid(h @ w2 + b2)


if __name__ == "__main__":
    key = jax.random.PRNGKey(0)
    kx, kp = jax.random.split(key)

    B = 16
    x = jax.random.normal(kx, (B, 100), dtype=jnp.float32)
    params = init_params(kp)

    out = decoder_forward(x, params)
    out = jax.block_until_ready(out)

    ref = decoder_reference(x, params)
    assert out.shape == (B, 784)
    assert jnp.allclose(out, ref, atol=1e-5, rtol=1e-5), (
        f"max abs err {jnp.max(jnp.abs(out - ref))}"
    )

    print("KERNEL_OK")
</pallas_src>

<mosaic_0001>
module attributes {stable_mosaic.version = 11 : i64} {
  func.func @decoder_kernel(%arg0: i32, %arg1: memref<16x128xf32, #tpu.memory_space<vmem>>, %arg2: memref<128x1024xf32, #tpu.memory_space<vmem>>, %arg3: memref<1x1024xf32, #tpu.memory_space<vmem>>, %arg4: memref<512x896xf32, #tpu.memory_space<vmem>>, %arg5: memref<1x896xf32, #tpu.memory_space<vmem>>, %arg6: memref<16x896xf32, #tpu.memory_space<vmem>>) attributes {dimension_semantics = [#tpu.dimension_semantics<parallel>], iteration_bounds = array<i64: 1>, scalar_prefetch = 0 : i64, scratch_operands = 0 : i64, tpu.core_type = #tpu.core_type<tc>, window_params = [{transform_indices = @transform_0, window_bounds = array<i64: 16, 128>}, {pipeline_mode = #tpu.pipeline_mode<synchronous>, transform_indices = @transform_1, window_bounds = array<i64: 128, 1024>}, {pipeline_mode = #tpu.pipeline_mode<synchronous>, transform_indices = @transform_2, window_bounds = array<i64: 1, 1024>}, {pipeline_mode = #tpu.pipeline_mode<synchronous>, transform_indices = @transform_3, window_bounds = array<i64: 512, 896>}, {pipeline_mode = #tpu.pipeline_mode<synchronous>, transform_indices = @transform_4, window_bounds = array<i64: 1, 896>}, {transform_indices = @transform_5, window_bounds = array<i64: 16, 896>}]} {
    %c0 = arith.constant 0 : index
    %c0_0 = arith.constant 0 : index
    %0 = vector.load %arg1[%c0, %c0_0] : memref<16x128xf32, #tpu.memory_space<vmem>>, vector<16x128xf32>
    %c0_1 = arith.constant 0 : index
    %c0_2 = arith.constant 0 : index
    %1 = vector.load %arg2[%c0_1, %c0_2] : memref<128x1024xf32, #tpu.memory_space<vmem>>, vector<128x1024xf32>
    %cst = arith.constant dense<0.000000e+00> : vector<16x1024xf32>
    %2 = tpu.matmul %0, %1, %cst {dimension_numbers = #tpu.dot_dimension_numbers<[1], [0], [0], [1], [0, 0, 1, 1], [], []>} : vector<16x128xf32>, vector<128x1024xf32>, vector<16x1024xf32> -> vector<16x1024xf32>
    %c0_3 = arith.constant 0 : index
    %c0_4 = arith.constant 0 : index
    %3 = vector.load %arg3[%c0_3, %c0_4] : memref<1x1024xf32, #tpu.memory_space<vmem>>, vector<1x1024xf32>
    %4 = vector.broadcast %3 : vector<1x1024xf32> to vector<16x1024xf32>
    %5 = arith.addf %2, %4 : vector<16x1024xf32>
    %6 = vector.extract_strided_slice %5 {offsets = [0, 0], sizes = [16, 512], strides = [1, 1]} : vector<16x1024xf32> to vector<16x512xf32>
    %7 = arith.negf %6 : vector<16x512xf32>
    %8 = math.exp %7 : vector<16x512xf32>
    %cst_5 = arith.constant 1.000000e+00 : f32
    %9 = vector.broadcast %cst_5 : f32 to vector<16x512xf32>
    %10 = arith.addf %9, %8 : vector<16x512xf32>
    %11 = arith.divf %9, %10 : vector<16x512xf32>
    %12 = vector.extract_strided_slice %5 {offsets = [0, 512], sizes = [16, 512], strides = [1, 1]} : vector<16x1024xf32> to vector<16x512xf32>
    %cst_6 = arith.constant 0.000000e+00 : f32
    %13 = vector.broadcast %cst_6 : f32 to vector<16x512xf32>
    %14 = arith.maximumf %12, %13 : vector<16x512xf32>
    %15 = arith.mulf %11, %14 : vector<16x512xf32>
    %c0_7 = arith.constant 0 : index
    %c0_8 = arith.constant 0 : index
    %16 = vector.load %arg4[%c0_7, %c0_8] : memref<512x896xf32, #tpu.memory_space<vmem>>, vector<512x896xf32>
    %cst_9 = arith.constant dense<0.000000e+00> : vector<16x896xf32>
    %17 = tpu.matmul %15, %16, %cst_9 {dimension_numbers = #tpu.dot_dimension_numbers<[1], [0], [0], [1], [0, 0, 1, 1], [], []>} : vector<16x512xf32>, vector<512x896xf32>, vector<16x896xf32> -> vector<16x896xf32>
    %c0_10 = arith.constant 0 : index
    %c0_11 = arith.constant 0 : index
    %18 = vector.load %arg5[%c0_10, %c0_11] : memref<1x896xf32, #tpu.memory_space<vmem>>, vector<1x896xf32>
    %19 = vector.broadcast %18 : vector<1x896xf32> to vector<16x896xf32>
    %20 = arith.addf %17, %19 : vector<16x896xf32>
    %21 = arith.negf %20 : vector<16x896xf32>
    %22 = math.exp %21 : vector<16x896xf32>
    %cst_12 = arith.constant 1.000000e+00 : f32
    %23 = vector.broadcast %cst_12 : f32 to vector<16x896xf32>
    %24 = arith.addf %23, %22 : vector<16x896xf32>
    %25 = arith.divf %23, %24 : vector<16x896xf32>
    %c0_13 = arith.constant 0 : index
    %c0_14 = arith.constant 0 : index
    %26 = vector.load %arg6[%c0_13, %c0_14] : memref<16x896xf32, #tpu.memory_space<vmem>>, vector<16x896xf32>
    tpu.vector_store %arg6[%c0_13, %c0_14], %25 {strides = array<i32>} : memref<16x896xf32, #tpu.memory_space<vmem>>, vector<16x896xf32>,
    return
  }
  func.func @transform_0(%arg0: i32) -> (i32, i32) {
    %c0_i32 = arith.constant 0 : i32
    %c0_i32_0 = arith.constant 0 : i32
    return %arg0, %c0_i32 : i32, i32
  }
  func.func @transform_1(%arg0: i32) -> (i32, i32) {
    %c0_i32 = arith.constant 0 : i32
    %c0_i32_0 = arith.constant 0 : i32
    %c0_i32_1 = arith.constant 0 : i32
    return %c0_i32, %c0_i32_0 : i32, i32
  }
  func.func @transform_2(%arg0: i32) -> (i32, i32) {
    %c0_i32 = arith.constant 0 : i32
    %c0_i32_0 = arith.constant 0 : i32
    %c0_i32_1 = arith.constant 0 : i32
    return %c0_i32, %c0_i32_0 : i32, i32
  }
  func.func @transform_3(%arg0: i32) -> (i32, i32) {
    %c0_i32 = arith.constant 0 : i32
    %c0_i32_0 = arith.constant 0 : i32
    %c0_i32_1 = arith.constant 0 : i32
    return %c0_i32, %c0_i32_0 : i32, i32
  }
  func.func @transform_4(%arg0: i32) -> (i32, i32) {
    %c0_i32 = arith.constant 0 : i32
    %c0_i32_0 = arith.constant 0 : i32
    %c0_i32_1 = arith.constant 0 : i32
    return %c0_i32, %c0_i32_0 : i32, i32
  }
  func.func @transform_5(%arg0: i32) -> (i32, i32) {
    %c0_i32 = arith.constant 0 : i32
    %c0_i32_0 = arith.constant 0 : i32
    return %arg0, %c0_i32 : i32, i32
  }
}

</mosaic_0001>

<bundles_post_ra>
// kernel: tpu_custom_call.1
= control target key start
LH: loop header
LB: loop body
LE: loop exit
PB: predicated region body
PF: predicated region fallthrough
CT: control target
= control target key end

     0   :  { %10 = vsyncpa [#allocation3], 0  ;;  %s3028_s0 = inlined_call_operand.hbm [shape: f32[16,128], index: 0, kind: input, shape index: {}]   ;;  %s3029_s1 = inlined_call_operand.hbm [shape: f32[128,1024], index: 1, kind: input, shape index: {}]   ;;  %s3030_s2 = inlined_call_operand.hbm [shape: f32[1,1024], index: 2, kind: input, shape index: {}]   ;;  %s3031_s3 = inlined_call_operand.hbm [shape: f32[512,896], index: 3, kind: input, shape index: {}]   ;;  %s3032_s4 = inlined_call_operand.hbm [shape: f32[1,896], index: 4, kind: input, shape index: {}]   ;;  %s3033_s5 = inlined_call_operand.hbm [shape: f32[16,896], index: 5, kind: output, shape index: {}]  }
   0x1   :  { %11 = vsyncpa [#allocation6], 0 }
   0x2   :  { %12 = vsyncpa [#allocation9], 0 }
   0x3   :  { %13 = vsyncpa [#allocation4], 0  ;;  %s2782_s18 = smov [#allocation5]   ;;  %s2642_s22 = scalar_lea.hbm %s3029_s1, 16384 }
   0x4   :  { %s31_s19 = sshll.u32 %s2782_s18, 4  ;;  %p2643_p0 = scmp.ne.s32.totalorder %s3029_s1, %s2642_s22  ;;  %s32_s19 = int_to_ptr.vmem [resolvable:$true] %s31_s19 }
   0x5   :  { %p2646_p1 = scmp.lt.u32.totalorder %s2642_s22, %s3029_s1 }
   0x7   :  { %p2648_p2 = pnand %p2646_p1, %p2643_p0 }
   0x9   :  { %2651 = shalt.err (!%p2648_p2)
}
   0xa   :  { %s2652_s27 = scalar_lea.vmem %s32_s19, 16384  ;;  %p2657_p4 = scmp.lt.s32.totalorder %s32_s19, %s32_s19 }
   0xb   :  { %p2653_p3 = scmp.ne.s32.totalorder %s32_s19, %s2652_s27  ;;  %p2658_p5 = scmp.lt.s32.totalorder %s2652_s27, %s2652_s27 }
   0xd   :  { %p2659_p6 = por %p2658_p5, %p2657_p4 }
   0xf   :  { %p2660_p7 = pnand %p2659_p6, %p2653_p3 }
  0x11   :  { %2663 = shalt.err (!%p2660_p7)
}
  0x12   :  { %s2783_s28 = smov 1024   ;;  %s2784_s29 = smov 64  }
  0x13   :  { %37 = dma.hbm_to_vmem [thread:$0]  %s3029_s1, 16384, %s32_s19, [#allocation6], %s2783_s28, %s2783_s28, %s2784_s29  }
  0x14   :  { %s2785_s7 = smov [#allocation8]   ;;  %s2664_s11 = scalar_lea.hbm %s3031_s3, 57344 }
  0x15   :  { %s53_s8 = sshll.u32 %s2785_s7, 4  ;;  %p2665_p8 = scmp.ne.s32.totalorder %s3031_s3, %s2664_s11  ;;  %s54_s8 = int_to_ptr.vmem [resolvable:$true] %s53_s8 }
  0x16   :  { %p2668_p9 = scmp.lt.u32.totalorder %s2664_s11, %s3031_s3 }
  0x18   :  { %p2670_p10 = pnand %p2668_p9, %p2665_p8 }
  0x1a   :  { %2673 = shalt.err (!%p2670_p10)
}
  0x1b   :  { %s2674_s16 = scalar_lea.vmem %s54_s8, 57344  ;;  %p2679_p12 = scmp.lt.s32.totalorder %s54_s8, %s54_s8 }
  0x1c   :  { %p2675_p11 = scmp.ne.s32.totalorder %s54_s8, %s2674_s16  ;;  %p2680_p13 = scmp.lt.s32.totalorder %s2674_s16, %s2674_s16 }
  0x1e   :  { %p2681_p0 = por %p2680_p13, %p2679_p12 }
  0x20   :  { %p2682_p1 = pnand %p2681_p0, %p2675_p11 }
  0x22   :  { %2685 = shalt.err (!%p2682_p1)
}
  0x23   :  { %s2786_s1 = smov 896   ;;  %s2787_s17 = smov 56  }
  0x24   :  { %59 = dma.hbm_to_vmem [thread:$0]  %s3031_s3, 57344, %s54_s8, [#allocation9], %s2786_s1, %s2786_s1, %s2787_s17  }
  0x25   :  { %s2788_s20 = smov [#allocation2]   ;;  %s2686_s24 = scalar_lea.hbm %s3028_s0, 256 }
  0x26   :  { %s19_s21 = sshll.u32 %s2788_s20, 4  ;;  %p2687_p2 = scmp.ne.s32.totalorder %s3028_s0, %s2686_s24  ;;  %s20_s21 = int_to_ptr.vmem [resolvable:$true] %s19_s21 }
  0x27   :  { %p2690_p3 = scmp.lt.u32.totalorder %s2686_s24, %s3028_s0 }
  0x29   :  { %p2692_p4 = pnand %p2690_p3, %p2687_p2 }
  0x2b   :  { %2695 = shalt.err (!%p2692_p4)
}
  0x2c   :  { %s2696_s29 = scalar_lea.vmem %s20_s21, 256  ;;  %p2701_p6 = scmp.lt.s32.totalorder %s20_s21, %s20_s21 }
  0x2d   :  { %p2697_p5 = scmp.ne.s32.totalorder %s20_s21, %s2696_s29  ;;  %p2702_p7 = scmp.lt.s32.totalorder %s2696_s29, %s2696_s29 }
  0x2f   :  { %p2703_p8 = por %p2702_p7, %p2701_p6 }
  0x31   :  { %p2704_p9 = pnand %p2703_p8, %p2697_p5 }
  0x33   :  { %2707 = shalt.err (!%p2704_p9)
}
  0x34   :  { %s2789_s3 = smov 128   ;;  %s2790_s30 = smov 8  }
  0x35   :  { %25 = dma.hbm_to_vmem [thread:$0]  %s3028_s0, 256, %s20_s21, [#allocation3], %s2789_s3, %s2789_s3, %s2790_s30  }
  0x36   :  { %s2791_s8 = smov [#allocation7]   ;;  %s2792_s10 = smov [#allocation10]  }
  0x37   :  { %s44_s9 = sshll.u32 %s2791_s8, 4  ;;  %s66_s11 = sshll.u32 %s2792_s10, 4  ;;  %s45_s9 = int_to_ptr.vmem [resolvable:$true] %s44_s9  ;;  %s67_s11 = int_to_ptr.vmem [resolvable:$true] %s66_s11 }
  0x38   :  { %s2708_s14 = scalar_lea.hbm %s3030_s2, 128 }
  0x39   :  { %p2709_p10 = scmp.ne.s32.totalorder %s3030_s2, %s2708_s14  ;;  %p2712_p11 = scmp.lt.u32.totalorder %s2708_s14, %s3030_s2 }
  0x3b   :  { %p2714_p12 = pnand %p2712_p11, %p2709_p10 }
  0x3d   :  { %2717 = shalt.err (!%p2714_p12)
}
  0x3e   :  { %s2718_s0 = scalar_lea.vmem %s45_s9, 128  ;;  %p2723_p0 = scmp.lt.s32.totalorder %s45_s9, %s45_s9 }
  0x3f   :  { %p2719_p13 = scmp.ne.s32.totalorder %s45_s9, %s2718_s0  ;;  %p2724_p1 = scmp.lt.s32.totalorder %s2718_s0, %s2718_s0 }
  0x41   :  { %p2725_p2 = por %p2724_p1, %p2723_p0 }
  0x43   :  { %p2726_p3 = pnand %p2725_p2, %p2719_p13 }
  0x45   :  { %2729 = shalt.err (!%p2726_p3)
}
  0x46   :  { %47 = dma.hbm_to_vmem [thread:$0]  %s3030_s2, 128, %s45_s9, [#allocation6]  }
  0x47   :  { %s2730_s24 = scalar_lea.hbm %s3032_s4, 112 }
  0x48   :  { %p2731_p4 = scmp.ne.s32.totalorder %s3032_s4, %s2730_s24  ;;  %p2734_p5 = scmp.lt.u32.totalorder %s2730_s24, %s3032_s4 }
  0x4a   :  { %p2736_p6 = pnand %p2734_p5, %p2731_p4 }
  0x4c   :  { %2739 = shalt.err (!%p2736_p6)
}
  0x4d   :  { %s2740_s29 = scalar_lea.vmem %s67_s11, 112  ;;  %s2744_s3 = scalar_lea.vmem %s67_s11, 128 }
  0x4e   :  { %p2741_p7 = scmp.ne.s32.totalorder %s67_s11, %s2740_s29  ;;  %p2745_p8 = scmp.lt.s32.totalorder %s67_s11, %s67_s11 }
  0x4f   :  { %p2746_p9 = scmp.lt.s32.totalorder %s2744_s3, %s2740_s29 }
  0x51   :  { %p2747_p10 = por %p2746_p9, %p2745_p8 }
  0x53   :  { %p2748_p11 = pnand %p2747_p10, %p2741_p7 }
  0x55   :  { %2751 = shalt.err (!%p2748_p11)
}
  0x56   :  { %69 = dma.hbm_to_vmem [thread:$0]  %s3032_s4, 112, %s67_s11, [#allocation9]  }
  0x57   :  { %2774 = dma.done.wait [#allocation3], 256  }
  0x58   :  { %2775 = vsyncadd [#allocation3], 4294967040 }
  0x59   :  { %2776 = dma.done.wait [#allocation6], 16512  }
  0x5a   :  { %2777 = vsyncadd [#allocation6], 4294950784 }
  0x5b   :  { %2778 = dma.done.wait [#allocation9], 57456  }
  0x5c   :  { %2779 = vsyncadd [#allocation9], 4294909840  ;;  %v2793_v0 = vmov 0.0   ;;  %v88_v1 = vld [vmem:[#allocation5 + $0x8] sm:$0xff]  ;;  %v87_v3 = vld [vmem:[#allocation5] sm:$0xff]  ;;  %s2794_s4 = smov [#allocation11]  }
  0x5d   :  { %321 = vmatprep.mubr.f32.mxu1 %v2793_v0  ;;  %475 = vmatprep.mubr.f32.mxu0 %v2793_v0  ;;  %v96_v2 = vld [vmem:[#allocation5 + $0x48] sm:$0xff]  ;;  %v95_v5 = vld [vmem:[#allocation5 + $0x40] sm:$0xff]  ;;  %s1829_s6 = sshll.u32 %s2794_s4, 4  ;;  %s1830_s6 = int_to_ptr.vmem [resolvable:$true] %s1829_s6 }
  0x5e   :  { %v1941_v4 = vpack.c.bf16 %v96_v2, %v88_v1  ;;  %v104_v6 = vld [vmem:[#allocation5 + $0x88] sm:$0xff]  ;;  %v1943_v8 = vpack.c.bf16 %v95_v5, %v87_v3  ;;  %v103_v10 = vld [vmem:[#allocation5 + $0x80] sm:$0xff]  ;;  %s2752_s7 = scalar_lea.vmem %s1830_s6, 1792  ;;  %p2757_p13 = scmp.lt.s32.totalorder %s1830_s6, %s1830_s6 }
  0x5f   :  { %v112_v7 = vld [vmem:[#allocation5 + $0xc8] sm:$0xff]  ;;  %v111_v11 = vld [vmem:[#allocation5 + $0xc0] sm:$0xff]  ;;  %p2753_p12 = scmp.ne.s32.totalorder %s1830_s6, %s2752_s7  ;;  %p2758_p0 = scmp.lt.s32.totalorder %s2752_s7, %s2752_s7 }
  0x60   :  { %v1945_v9 = vpack.c.bf16 %v112_v7, %v104_v6  ;;  %v120_v12 = vld [vmem:[#allocation5 + $0x108] sm:$0xff]  ;;  %1942 = vmatprep.subr.bf16.mxu1 %v1941_v4  ;;  %v1947_v14 = vpack.c.bf16 %v111_v11, %v103_v10  ;;  %v119_v16 = vld [vmem:[#allocation5 + $0x100] sm:$0xff] }
  0x61   :  { %v128_v13 = vld [vmem:[#allocation5 + $0x148] sm:$0xff]  ;;  %1944 = vmatpush1.bf16.msra.mxu1 %v1943_v8  ;;  %v127_v17 = vld [vmem:[#allocation5 + $0x140] sm:$0xff]  ;;  %p2759_p1 = por %p2758_p0, %p2757_p13 }
  0x62   :  { %1946 = vmatprep.subr.bf16.mxu1 %v1945_v9  ;;  %v1949_v15 = vpack.c.bf16 %v128_v13, %v120_v12  ;;  %v136_v18 = vld [vmem:[#allocation5 + $0x188] sm:$0xff]  ;;  %v1951_v20 = vpack.c.bf16 %v127_v17, %v119_v16  ;;  %v135_v21 = vld [vmem:[#allocation5 + $0x180] sm:$0xff] }
  0x63   :  { %v144_v19 = vld [vmem:[#allocation5 + $0x1c8] sm:$0xff]  ;;  %v143_v25 = vld [vmem:[#allocation5 + $0x1c0] sm:$0xff]  ;;  %p2760_p2 = pnand %p2759_p1, %p2753_p12 }
  0x64   :  { %v92_v22 = vld [vmem:[#allocation5 + $0x28] sm:$0xff]  ;;  %v1953_v24 = vpack.c.bf16 %v144_v19, %v136_v18  ;;  %v91_v27 = vld [vmem:[#allocation5 + $0x20] sm:$0xff]  ;;  %v1955_v35 = vpack.c.bf16 %v143_v25, %v135_v21 }
  0x65   :  { %1948 = vmatpush1.bf16.msra.mxu1 %v1947_v14  ;;  %v100_v23 = vld [vmem:[#allocation5 + $0x68] sm:$0xff]  ;;  %v99_v28 = vld [vmem:[#allocation5 + $0x60] sm:$0xff] }
  0x66   :  { %1950 = vmatprep.subr.bf16.mxu1 %v1949_v15  ;;  %v2005_v26 = vpack.c.bf16 %v100_v23, %v92_v22  ;;  %v152_v29 = vld [vmem:[#allocation5 + $0x208] sm:$0xff]  ;;  %v2007_v31 = vpack.c.bf16 %v99_v28, %v91_v27  ;;  %v151_v33 = vld [vmem:[#allocation5 + $0x200] sm:$0xff]  ;;  %v90_v22 = vld [vmem:[#allocation5 + $0x18] sm:$0xff] }
  0x67   :  { %v160_v30 = vld [vmem:[#allocation5 + $0x248] sm:$0xff]  ;;  %v159_v36 = vld [vmem:[#allocation5 + $0x240] sm:$0xff]  ;;  %v98_v23 = vld [vmem:[#allocation5 + $0x58] sm:$0xff] }
  0x68   :  { %v108_v32 = vld [vmem:[#allocation5 + $0xa8] sm:$0xff]  ;;  %2006 = vmatprep.subr.bf16.mxu0 %v2005_v26  ;;  %v107_v38 = vld [vmem:[#allocation5 + $0xa0] sm:$0xff]  ;;  %v1957_v40 = vpack.c.bf16 %v160_v30, %v152_v29  ;;  %v1959_v51 = vpack.c.bf16 %v159_v36, %v151_v33  ;;  %v1973_v29 = vpack.c.bf16 %v98_v23, %v90_v22  ;;  %v89_v30 = vld [vmem:[#allocation5 + $0x10] sm:$0xff] }
  0x69   :  { %v116_v34 = vld [vmem:[#allocation5 + $0xe8] sm:$0xff]  ;;  %1952 = vmatpush1.bf16.msra.mxu1 %v1951_v20  ;;  %2008 = vmatpush1.bf16.msra.mxu0 %v2007_v31  ;;  %v115_v39 = vld [vmem:[#allocation5 + $0xe0] sm:$0xff]  ;;  %v97_v31 = vld [vmem:[#allocation5 + $0x50] sm:$0xff] }
  0x6a   :  { %v2009_v37 = vpack.c.bf16 %v116_v34, %v108_v32  ;;  %1954 = vmatprep.subr.bf16.mxu1 %v1953_v24  ;;  %v168_v41 = vld [vmem:[#allocation5 + $0x288] sm:$0xff]  ;;  %v2011_v42 = vpack.c.bf16 %v115_v39, %v107_v38  ;;  %v123_v47 = vld [vmem:[#allocation5 + $0x120] sm:$0xff]  ;;  %v106_v34 = vld [vmem:[#allocation5 + $0x98] sm:$0xff]  ;;  %v1975_v38 = vpack.c.bf16 %v97_v31, %v89_v30 }
  0x6b   :  { %v124_v43 = vld [vmem:[#allocation5 + $0x128] sm:$0xff]  ;;  %v131_v48 = vld [vmem:[#allocation5 + $0x160] sm:$0xff]  ;;  %v2890_v36 = vld [vmem:[#allocation2] sm:$0xff] }
  0x6c   :  { %v132_v44 = vld [vmem:[#allocation5 + $0x168] sm:$0xff]  ;;  %2010 = vmatprep.subr.bf16.mxu0 %v2009_v37  ;;  %v167_v52 = vld [vmem:[#allocation5 + $0x280] sm:$0xff]  ;;  %v2015_v54 = vpack.c.bf16 %v131_v48, %v123_v47  ;;  %v194_v23 = vld [vmem:[#allocation5 + $0x358] sm:$0xff] }
  0x6d   :  { %v176_v45 = vld [vmem:[#allocation5 + $0x2c8] sm:$0xff]  ;;  %v2013_v46 = vpack.c.bf16 %v132_v44, %v124_v43  ;;  %1956 = vmatpush1.bf16.msra.mxu1 %v1955_v35  ;;  %v175_v53 = vld [vmem:[#allocation5 + $0x2c0] sm:$0xff]  ;;  %2012 = vmatpush1.bf16.msra.mxu0 %v2011_v42  ;;  %v114_v35 = vld [vmem:[#allocation5 + $0xd8] sm:$0xff] }
  0x6e   :  { %v140_v49 = vld [vmem:[#allocation5 + $0x1a8] sm:$0xff]  ;;  %1958 = vmatprep.subr.bf16.mxu1 %v1957_v40  ;;  %v1961_v55 = vpack.c.bf16 %v176_v45, %v168_v41  ;;  %v139_v58 = vld [vmem:[#allocation5 + $0x1a0] sm:$0xff]  ;;  %v1963_v63 = vpack.c.bf16 %v175_v53, %v167_v52  ;;  %v1977_v41 = vpack.c.bf16 %v114_v35, %v106_v34  ;;  %v105_v43 = vld [vmem:[#allocation5 + $0x90] sm:$0xff] }
  0x6f   :  { %v148_v50 = vld [vmem:[#allocation5 + $0x1e8] sm:$0xff]  ;;  %2014 = vmatprep.subr.bf16.mxu0 %v2013_v46  ;;  %v147_v59 = vld [vmem:[#allocation5 + $0x1e0] sm:$0xff]  ;;  %v113_v44 = vld [vmem:[#allocation5 + $0xd0] sm:$0xff] }
  0x70   :  { %v184_v56 = vld [vmem:[#allocation5 + $0x308] sm:$0xff]  ;;  %v2017_v57 = vpack.c.bf16 %v148_v50, %v140_v49  ;;  %v183_v1 = vld [vmem:[#allocation5 + $0x300] sm:$0xff]  ;;  %v2019_v3 = vpack.c.bf16 %v147_v59, %v139_v58  ;;  %v122_v45 = vld [vmem:[#allocation5 + $0x118] sm:$0xff]  ;;  %v1979_v48 = vpack.c.bf16 %v113_v44, %v105_v43 }
  0x71   :  { %v192_v60 = vld [vmem:[#allocation5 + $0x348] sm:$0xff]  ;;  %1960 = vmatpush1.bf16.msra.mxu1 %v1959_v51  ;;  %v191_v2 = vld [vmem:[#allocation5 + $0x340] sm:$0xff]  ;;  %2016 = vmatpush1.bf16.msra.mxu0 %v2015_v54  ;;  %v130_v46 = vld [vmem:[#allocation5 + $0x158] sm:$0xff] }
  0x72   :  { %v156_v61 = vld [vmem:[#allocation5 + $0x228] sm:$0xff]  ;;  %1962 = vmatprep.subr.bf16.mxu1 %v1961_v55  ;;  %v1965_v4 = vpack.c.bf16 %v192_v60, %v184_v56  ;;  %2018 = vmatprep.subr.bf16.mxu0 %v2017_v57  ;;  %v155_v7 = vld [vmem:[#allocation5 + $0x220] sm:$0xff]  ;;  %v1967_v12 = vpack.c.bf16 %v191_v2, %v183_v1  ;;  %v2893_v49 = vld [vmem:[#allocation2 + $0x8] sm:$0xff]  ;;  %v1981_v50 = vpack.c.bf16 %v130_v46, %v122_v45 }
  0x73   :  { %v164_v62 = vld [vmem:[#allocation5 + $0x268] sm:$0xff]  ;;  %v163_v8 = vld [vmem:[#allocation5 + $0x260] sm:$0xff]  ;;  %v121_v51 = vld [vmem:[#allocation5 + $0x110] sm:$0xff] }
  0x74   :  { %v200_v5 = vld [vmem:[#allocation5 + $0x388] sm:$0xff]  ;;  %v2021_v6 = vpack.c.bf16 %v164_v62, %v156_v61  ;;  %v199_v13 = vld [vmem:[#allocation5 + $0x380] sm:$0xff]  ;;  %v2023_v15 = vpack.c.bf16 %v163_v8, %v155_v7  ;;  %v129_v52 = vld [vmem:[#allocation5 + $0x150] sm:$0xff] }
  0x75   :  { %v208_v9 = vld [vmem:[#allocation5 + $0x3c8] sm:$0xff]  ;;  %1964 = vmatpush1.bf16.msra.mxu1 %v1963_v63  ;;  %v207_v14 = vld [vmem:[#allocation5 + $0x3c0] sm:$0xff]  ;;  %2020 = vmatpush1.bf16.msra.mxu0 %v2019_v3  ;;  %v138_v53 = vld [vmem:[#allocation5 + $0x198] sm:$0xff]  ;;  %v1983_v55 = vpack.c.bf16 %v129_v52, %v121_v51 }
  0x76   :  { %v172_v10 = vld [vmem:[#allocation5 + $0x2a8] sm:$0xff]  ;;  %1966 = vmatprep.subr.bf16.mxu1 %v1965_v4  ;;  %v1969_v16 = vpack.c.bf16 %v208_v9, %v200_v5  ;;  %2022 = vmatprep.subr.bf16.mxu0 %v2021_v6  ;;  %v171_v18 = vld [vmem:[#allocation5 + $0x2a0] sm:$0xff]  ;;  %v1971_v24 = vpack.c.bf16 %v207_v14, %v199_v13  ;;  %v146_v54 = vld [vmem:[#allocation5 + $0x1d8] sm:$0xff] }
  0x77   :  { %v180_v11 = vld [vmem:[#allocation5 + $0x2e8] sm:$0xff]  ;;  %v179_v19 = vld [vmem:[#allocation5 + $0x2e0] sm:$0xff]  ;;  %v1985_v56 = vpack.c.bf16 %v146_v54, %v138_v53  ;;  %v137_v57 = vld [vmem:[#allocation5 + $0x190] sm:$0xff] }
  0x78   :  { %v2025_v17 = vpack.c.bf16 %v180_v11, %v172_v10  ;;  %v188_v20 = vld [vmem:[#allocation5 + $0x328] sm:$0xff]  ;;  %v2027_v25 = vpack.c.bf16 %v179_v19, %v171_v18  ;;  %v187_v26 = vld [vmem:[#allocation5 + $0x320] sm:$0xff]  ;;  %v145_v58 = vld [vmem:[#allocation5 + $0x1d0] sm:$0xff] }
  0x79   :  { %v196_v21 = vld [vmem:[#allocation5 + $0x368] sm:$0xff]  ;;  %1968 = vmatpush1.bf16.msra.mxu1 %v1967_v12  ;;  %2024 = vmatpush1.bf16.msra.mxu0 %v2023_v15  ;;  %v195_v27 = vld [vmem:[#allocation5 + $0x360] sm:$0xff]  ;;  %v154_v59 = vld [vmem:[#allocation5 + $0x218] sm:$0xff]  ;;  %v1987_v63 = vpack.c.bf16 %v145_v58, %v137_v57 }
  0x7a   :  { %1970 = vmatprep.subr.bf16.mxu1 %v1969_v16  ;;  %2026 = vmatprep.subr.bf16.mxu0 %v2025_v17  ;;  %v2029_v28 = vpack.c.bf16 %v196_v21, %v188_v20  ;;  %v204_v32 = vld [vmem:[#allocation5 + $0x3a8] sm:$0xff]  ;;  %v2031_v37 = vpack.c.bf16 %v195_v27, %v187_v26  ;;  %v203_v39 = vld [vmem:[#allocation5 + $0x3a0] sm:$0xff]  ;;  %v162_v60 = vld [vmem:[#allocation5 + $0x258] sm:$0xff] }
  0x7b   :  { %v212_v33 = vld [vmem:[#allocation5 + $0x3e8] sm:$0xff]  ;;  %v211_v42 = vld [vmem:[#allocation5 + $0x3e0] sm:$0xff]  ;;  %v630_v61 = vld [vmem:[#allocation8 + $0x8] sm:$0xff]  ;;  %v1989_v4 = vpack.c.bf16 %v162_v60, %v154_v59 }
  0x7c   :  { %v2033_v40 = vpack.c.bf16 %v212_v33, %v204_v32  ;;  %v2035_v47 = vpack.c.bf16 %v211_v42, %v203_v39  ;;  %v637_v62 = vld [vmem:[#allocation8 + $0x40] sm:$0xff]  ;;  %v153_v1 = vld [vmem:[#allocation5 + $0x210] sm:$0xff]  ;;  %v170_v6 = vld [vmem:[#allocation5 + $0x298] sm:$0xff] }
  0x7d   :  { %1972 = vmatpush1.bf16.msra.mxu1 %v1971_v24  ;;  %2028 = vmatpush1.bf16.msra.mxu0 %v2027_v25  ;;  %v2069_v2 = vpack.c.bf16 %v637_v62, %v630_v61  ;;  %v629_v3 = vld [vmem:[#allocation8] sm:$0xff]  ;;  %v161_v5 = vld [vmem:[#allocation5 + $0x250] sm:$0xff]  ;;  %v636_v7 = vld [vmem:[#allocation8 + $0x38] sm:$0xff] }
  0x7e   :  { %2030 = vmatprep.subr.bf16.mxu0 %v2029_v28  ;;  %1974 = vmatprep.subr.bf16.mxu1 %v1973_v29  ;;  %v178_v8 = vld [vmem:[#allocation5 + $0x2d8] sm:$0xff]  ;;  %v2071_v9 = vpack.c.bf16 %v636_v7, %v629_v3  ;;  %v644_v10 = vld [vmem:[#allocation8 + $0x78] sm:$0xff]  ;;  %v650_v14 = vld [vmem:[#allocation8 + $0xa8] sm:$0xff]  ;;  %v1991_v15 = vpack.c.bf16 %v161_v5, %v153_v1 }
  0x7f   :  { %v651_v11 = vld [vmem:[#allocation8 + $0xb0] sm:$0xff]  ;;  %v169_v16 = vld [vmem:[#allocation5 + $0x290] sm:$0xff]  ;;  %v1993_v19 = vpack.c.bf16 %v178_v8, %v170_v6  ;;  %v665_v22 = vld [vmem:[#allocation8 + $0x120] sm:$0xff] }
  0x80   :  { %322 = vmatmul.mubr.f32.vlgmr.msra.gmra.mrb[0].mxu1 %v2890_v36  ;;  %v2073_v12 = vpack.c.bf16 %v651_v11, %v644_v10  ;;  %v643_v13 = vld [vmem:[#allocation8 + $0x70] sm:$0xff]  ;;  %v658_v18 = vld [vmem:[#allocation8 + $0xe8] sm:$0xff]  ;;  %v657_v25 = vld [vmem:[#allocation8 + $0xe0] sm:$0xff] }
  0x81   :  { %2032 = vmatpush1.bf16.msra.mxu0 %v2031_v37  ;;  %1976 = vmatpush1.bf16.msra.mxu1 %v1975_v38  ;;  %v2075_v17 = vpack.c.bf16 %v650_v14, %v643_v13  ;;  %v177_v20 = vld [vmem:[#allocation5 + $0x2d0] sm:$0xff]  ;;  %v186_v21 = vld [vmem:[#allocation5 + $0x318] sm:$0xff]  ;;  %v2077_v24 = vpack.c.bf16 %v665_v22, %v658_v18  ;;  %v664_v26 = vld [vmem:[#allocation8 + $0x118] sm:$0xff] }
  0x82   :  { %2034 = vmatprep.subr.bf16.mxu0 %v2033_v40  ;;  %1978 = vmatprep.subr.bf16.mxu1 %v1977_v41  ;;  %v672_v27 = vld [vmem:[#allocation8 + $0x158] sm:$0xff]  ;;  %v679_v28 = vld [vmem:[#allocation8 + $0x190] sm:$0xff]  ;;  %v1995_v29 = vpack.c.bf16 %v177_v20, %v169_v16  ;;  %v185_v30 = vld [vmem:[#allocation5 + $0x310] sm:$0xff]  ;;  %v2079_v32 = vpack.c.bf16 %v664_v26, %v657_v25  ;;  %v1997_v33 = vpack.c.bf16 %v194_v23, %v186_v21 }
  0x83   :  { %327 = vmatprep.mubr.f32.mxu1 %v2793_v0  ;;  %v193_v31 = vld [vmem:[#allocation5 + $0x350] sm:$0xff]  ;;  %v202_v34 = vld [vmem:[#allocation5 + $0x398] sm:$0xff]  ;;  %v2081_v35 = vpack.c.bf16 %v679_v28, %v672_v27  ;;  %v693_v41 = vld [vmem:[#allocation8 + $0x200] sm:$0xff] }
  0x84   :  { %328 = vmatmul.mubr.f32.gmra.mrb[2].mxu1 %v2893_v49  ;;  %v671_v37 = vld [vmem:[#allocation8 + $0x150] sm:$0xff]  ;;  %v678_v38 = vld [vmem:[#allocation8 + $0x188] sm:$0xff]  ;;  %v1999_v42 = vpack.c.bf16 %v193_v31, %v185_v30  ;;  %v692_v51 = vld [vmem:[#allocation8 + $0x1f8] sm:$0xff] }
  0x85   :  { %2036 = vmatpush1.bf16.msra.mxu0 %v2035_v47  ;;  %1980 = vmatpush1.bf16.msra.mxu1 %v1979_v48  ;;  %v210_v39 = vld [vmem:[#allocation5 + $0x3d8] sm:$0xff]  ;;  %v686_v40 = vld [vmem:[#allocation8 + $0x1c8] sm:$0xff]  ;;  %v2083_v45 = vpack.c.bf16 %v678_v38, %v671_v37  ;;  %v700_v53 = vld [vmem:[#allocation8 + $0x238] sm:$0xff] }
  0x86   :  { %1982 = vmatprep.subr.bf16.mxu1 %v1981_v50  ;;  %398 = vmatprep.mubr.f32.mxu1 %v2793_v0  ;;  %v201_v43 = vld [vmem:[#allocation5 + $0x390] sm:$0xff]  ;;  %v2001_v46 = vpack.c.bf16 %v210_v39, %v202_v34  ;;  %v94_v47 = vld [vmem:[#allocation5 + $0x38] sm:$0xff]  ;;  %v2085_v48 = vpack.c.bf16 %v693_v41, %v686_v40  ;;  %v685_v50 = vld [vmem:[#allocation8 + $0x1c0] sm:$0xff] }
  0x87   :  { %2070 = vmatprep.subr.bf16.mxu0 %v2069_v2  ;;  %v209_v44 = vld [vmem:[#allocation5 + $0x3d0] sm:$0xff]  ;;  %v102_v52 = vld [vmem:[#allocation5 + $0x78] sm:$0xff]  ;;  %v721_v3 = vld [vmem:[#allocation8 + $0x2e0] sm:$0xff] }
  0x88   :  { %476 = vmatmul.mubr.f32.vlgmr.msra.gmra.mrb[0].mxu0 %v2890_v36  ;;  %v707_v54 = vld [vmem:[#allocation8 + $0x270] sm:$0xff]  ;;  %v2037_v57 = vpack.c.bf16 %v102_v52, %v94_v47  ;;  %v93_v58 = vld [vmem:[#allocation5 + $0x30] sm:$0xff]  ;;  %v720_v13 = vld [vmem:[#allocation8 + $0x2d8] sm:$0xff] }
  0x89   :  { %1984 = vmatpush1.bf16.msra.mxu1 %v1983_v55  ;;  %481 = vmatprep.mubr.f32.mxu0 %v2793_v0  ;;  %v2003_v55 = vpack.c.bf16 %v209_v44, %v201_v43  ;;  %v101_v59 = vld [vmem:[#allocation5 + $0x70] sm:$0xff]  ;;  %v110_v60 = vld [vmem:[#allocation5 + $0xb8] sm:$0xff]  ;;  %v2089_v61 = vpack.c.bf16 %v707_v54, %v700_v53  ;;  %v728_v14 = vld [vmem:[#allocation8 + $0x318] sm:$0xff] }
  0x8a   :  { %1986 = vmatprep.subr.bf16.mxu1 %v1985_v56  ;;  %2072 = vmatpush1.bf16.msra.mxu0 %v2071_v9  ;;  %v2087_v56 = vpack.c.bf16 %v692_v51, %v685_v50  ;;  %v118_v62 = vld [vmem:[#allocation5 + $0xf8] sm:$0xff]  ;;  %v706_v1 = vld [vmem:[#allocation8 + $0x268] sm:$0xff] }
  0x8b   :  { %2074 = vmatprep.subr.bf16.mxu0 %v2073_v12  ;;  %v714_v2 = vld [vmem:[#allocation8 + $0x2a8] sm:$0xff]  ;;  %v2041_v5 = vpack.c.bf16 %v118_v62, %v110_v60  ;;  %v126_v8 = vld [vmem:[#allocation5 + $0x138] sm:$0xff]  ;;  %v713_v12 = vld [vmem:[#allocation8 + $0x2a0] sm:$0xff] }
  0x8c   :  { %482 = vmatmul.mubr.f32.gmra.mrb[2].mxu0 %v2893_v49  ;;  %v109_v6 = vld [vmem:[#allocation5 + $0xb0] sm:$0xff]  ;;  %v134_v10 = vld [vmem:[#allocation5 + $0x178] sm:$0xff]  ;;  %v2093_v11 = vpack.c.bf16 %v721_v3, %v714_v2  ;;  %v2095_v21 = vpack.c.bf16 %v720_v13, %v713_v12  ;;  %v681_v13 = vld [vmem:[#allocation8 + $0x1a0] sm:$0xff] }
  0x8d   :  { %1988 = vmatpush1.bf16.msra.mxu1 %v1987_v63  ;;  %v699_v63 = vld [vmem:[#allocation8 + $0x230] sm:$0xff]  ;;  %v117_v7 = vld [vmem:[#allocation5 + $0xf0] sm:$0xff] }
  0x8e   :  { %1990 = vmatprep.subr.bf16.mxu1 %v1989_v4  ;;  %2076 = vmatpush1.bf16.msra.mxu0 %v2075_v17  ;;  %v2039_v4 = vpack.c.bf16 %v101_v59, %v93_v58  ;;  %v2091_v9 = vpack.c.bf16 %v706_v1, %v699_v63  ;;  %v2043_v16 = vpack.c.bf16 %v117_v7, %v109_v6  ;;  %v125_v18 = vld [vmem:[#allocation5 + $0x130] sm:$0xff]  ;;  %v142_v20 = vld [vmem:[#allocation5 + $0x1b8] sm:$0xff]  ;;  %v653_v1 = vld [vmem:[#allocation8 + $0xc0] sm:$0xff] }
  0x8f   :  { %2078 = vmatprep.subr.bf16.mxu0 %v2077_v24  ;;  %v2045_v17 = vpack.c.bf16 %v134_v10, %v126_v8  ;;  %v150_v22 = vld [vmem:[#allocation5 + $0x1f8] sm:$0xff]  ;;  %v734_v25 = vld [vmem:[#allocation8 + $0x348] sm:$0xff]  ;;  %v660_v6 = vld [vmem:[#allocation8 + $0xf8] sm:$0xff] }
  0x90   :  { %v727_v24 = vld [vmem:[#allocation8 + $0x310] sm:$0xff]  ;;  %v2049_v27 = vpack.c.bf16 %v150_v22, %v142_v20  ;;  %v141_v28 = vld [vmem:[#allocation5 + $0x1b0] sm:$0xff] }
  0x91   :  { %1992 = vmatpush1.bf16.msra.mxu1 %v1991_v15  ;;  %v735_v15 = vld [vmem:[#allocation8 + $0x350] sm:$0xff]  ;;  %v2099_v30 = vpack.c.bf16 %v734_v25, %v727_v24  ;;  %v165_v37 = vld [vmem:[#allocation5 + $0x270] sm:$0xff]  ;;  %v701_v25 = vld [vmem:[#allocation8 + $0x240] sm:$0xff] }
  0x92   :  { %1994 = vmatprep.subr.bf16.mxu1 %v1993_v19  ;;  %2080 = vmatpush1.bf16.msra.mxu0 %v2079_v32  ;;  %v133_v19 = vld [vmem:[#allocation5 + $0x170] sm:$0xff]  ;;  %v2097_v23 = vpack.c.bf16 %v735_v15, %v728_v14  ;;  %v158_v31 = vld [vmem:[#allocation5 + $0x238] sm:$0xff] }
  0x93   :  { %2082 = vmatprep.subr.bf16.mxu0 %v2081_v35  ;;  %v2047_v26 = vpack.c.bf16 %v133_v19, %v125_v18  ;;  %v166_v32 = vld [vmem:[#allocation5 + $0x278] sm:$0xff]  ;;  %v157_v35 = vld [vmem:[#allocation5 + $0x230] sm:$0xff]  ;;  %v688_v18 = vld [vmem:[#allocation8 + $0x1d8] sm:$0xff] }
  0x94   :  { %v2053_v34 = vpack.c.bf16 %v166_v32, %v158_v31  ;;  %v174_v38 = vld [vmem:[#allocation5 + $0x2b8] sm:$0xff]  ;;  %v2055_v40 = vpack.c.bf16 %v165_v37, %v157_v35  ;;  %v181_v43 = vld [vmem:[#allocation5 + $0x2f0] sm:$0xff] }
  0x95   :  { %1996 = vmatpush1.bf16.msra.mxu1 %v1995_v29  ;;  %v149_v29 = vld [vmem:[#allocation5 + $0x1f0] sm:$0xff]  ;;  %v182_v39 = vld [vmem:[#allocation5 + $0x2f8] sm:$0xff] }
  0x96   :  { %1998 = vmatprep.subr.bf16.mxu1 %v1997_v33  ;;  %2084 = vmatpush1.bf16.msra.mxu0 %v2083_v45  ;;  %v2051_v33 = vpack.c.bf16 %v149_v29, %v141_v28  ;;  %v2057_v41 = vpack.c.bf16 %v182_v39, %v174_v38  ;;  %v190_v44 = vld [vmem:[#allocation5 + $0x338] sm:$0xff]  ;;  %v197_v50 = vld [vmem:[#allocation5 + $0x370] sm:$0xff] }
  0x97   :  { %2086 = vmatprep.subr.bf16.mxu0 %v2085_v48  ;;  %v198_v45 = vld [vmem:[#allocation5 + $0x378] sm:$0xff]  ;;  %v189_v48 = vld [vmem:[#allocation5 + $0x330] sm:$0xff] }
  0x98   :  { %v2061_v47 = vpack.c.bf16 %v198_v45, %v190_v44  ;;  %v206_v51 = vld [vmem:[#allocation5 + $0x3b8] sm:$0xff]  ;;  %v2063_v53 = vpack.c.bf16 %v197_v50, %v189_v48  ;;  %v638_v62 = vld [vmem:[#allocation8 + $0x48] sm:$0xff]  ;;  %v729_v50 = vld [vmem:[#allocation8 + $0x320] sm:$0xff] }
  0x99   :  { %2000 = vmatpush1.bf16.msra.mxu1 %v1999_v42  ;;  %v173_v42 = vld [vmem:[#allocation5 + $0x2b0] sm:$0xff]  ;;  %v214_v52 = vld [vmem:[#allocation5 + $0x3f8] sm:$0xff] }
  0x9a   :  { %2002 = vmatprep.subr.bf16.mxu1 %v2001_v46  ;;  %2088 = vmatpush1.bf16.msra.mxu0 %v2087_v56  ;;  %v2059_v46 = vpack.c.bf16 %v181_v43, %v173_v42  ;;  %v2065_v54 = vpack.c.bf16 %v214_v52, %v206_v51  ;;  %v213_v56 = vld [vmem:[#allocation5 + $0x3f0] sm:$0xff]  ;;  %v639_v58 = vld [vmem:[#allocation8 + $0x50] sm:$0xff]  ;;  %v756_v42 = vld [vmem:[#allocation8 + $0x3f8] sm:$0xff] }
  0x9b   :  { %2090 = vmatprep.subr.bf16.mxu0 %v2089_v61  ;;  %v631_v61 = vld [vmem:[#allocation8 + $0x10] sm:$0xff]  ;;  %v646_v63 = vld [vmem:[#allocation8 + $0x88] sm:$0xff]  ;;  %v736_v51 = vld [vmem:[#allocation8 + $0x358] sm:$0xff] }
  0x9c   :  { %v2199_v2 = vpack.c.bf16 %v638_v62, %v631_v61  ;;  %v2201_v3 = vpack.c.bf16 %v653_v1, %v646_v63  ;;  %v667_v7 = vld [vmem:[#allocation8 + $0x130] sm:$0xff]  ;;  %v674_v12 = vld [vmem:[#allocation8 + $0x168] sm:$0xff] }
  0x9d   :  { %2004 = vmatpush1.bf16.msra.mxu1 %v2003_v55  ;;  %v205_v55 = vld [vmem:[#allocation5 + $0x3b0] sm:$0xff]  ;;  %v659_v10 = vld [vmem:[#allocation8 + $0xf0] sm:$0xff]  ;;  %v2209_v15 = vpack.c.bf16 %v681_v13, %v674_v12  ;;  %v764_v12 = vld [vmem:[#allocation8 + $0x438] sm:$0xff] }
  0x9e   :  { %2038 = vmatprep.subr.bf16.mxu1 %v2037_v57  ;;  %2092 = vmatpush1.bf16.msra.mxu0 %v2091_v9  ;;  %v632_v57 = vld [vmem:[#allocation8 + $0x18] sm:$0xff]  ;;  %v2067_v59 = vpack.c.bf16 %v213_v56, %v205_v55  ;;  %v2205_v9 = vpack.c.bf16 %v667_v7, %v660_v6  ;;  %v687_v20 = vld [vmem:[#allocation8 + $0x1d0] sm:$0xff]  ;;  %v702_v22 = vld [vmem:[#allocation8 + $0x248] sm:$0xff] }
  0x9f   :  { %2094 = vmatprep.subr.bf16.mxu0 %v2093_v11  ;;  %v2197_v60 = vpack.c.bf16 %v639_v58, %v632_v57  ;;  %v666_v11 = vld [vmem:[#allocation8 + $0x128] sm:$0xff]  ;;  %v723_v28 = vld [vmem:[#allocation8 + $0x2f0] sm:$0xff]  ;;  %v777_v56 = vld [vmem:[#allocation8 + $0x4a0] sm:$0xff]  ;;  %v2227_v57 = vpack.c.bf16 %v736_v51, %v729_v50 }
  0xa0   :  { %399 = vmatmul.mubr.f32.vlgmr.msra.gmra.mrb[4].mxu1 %v2890_v36  ;;  %v2207_v14 = vpack.c.bf16 %v666_v11, %v659_v10  ;;  %v742_v29 = vld [vmem:[#allocation8 + $0x388] sm:$0xff]  ;;  %v715_v37 = vld [vmem:[#allocation8 + $0x2b0] sm:$0xff]  ;;  %v757_v11 = vld [vmem:[#allocation8 + $0x400] sm:$0xff] }
  0xa1   :  { %2040 = vmatpush1.bf16.msra.mxu1 %v2039_v4  ;;  %404 = vmatprep.mubr.f32.mxu1 %v2793_v0  ;;  %v645_v4 = vld [vmem:[#allocation8 + $0x80] sm:$0xff]  ;;  %v722_v38 = vld [vmem:[#allocation8 + $0x2e8] sm:$0xff]  ;;  %v763_v43 = vld [vmem:[#allocation8 + $0x430] sm:$0xff] }
  0xa2   :  { %2042 = vmatprep.subr.bf16.mxu1 %v2041_v5  ;;  %2096 = vmatpush1.bf16.msra.mxu0 %v2095_v21  ;;  %v652_v5 = vld [vmem:[#allocation8 + $0xb8] sm:$0xff]  ;;  %v694_v21 = vld [vmem:[#allocation8 + $0x208] sm:$0xff]  ;;  %v2223_v44 = vpack.c.bf16 %v722_v38, %v715_v37  ;;  %v2105_v45 = vpack.c.bf16 %v763_v43, %v756_v42  ;;  %v743_v62 = vld [vmem:[#allocation8 + $0x390] sm:$0xff] }
  0xa3   :  { %2098 = vmatprep.subr.bf16.mxu0 %v2097_v23  ;;  %v2203_v8 = vpack.c.bf16 %v652_v5, %v645_v4  ;;  %v709_v23 = vld [vmem:[#allocation8 + $0x280] sm:$0xff]  ;;  %v2215_v24 = vpack.c.bf16 %v694_v21, %v687_v20  ;;  %v770_v55 = vld [vmem:[#allocation8 + $0x468] sm:$0xff]  ;;  %v784_v4 = vld [vmem:[#allocation8 + $0x4d8] sm:$0xff] }
  0xa4   :  { %405 = vmatmul.mubr.f32.gmra.mrb[6].mxu1 %v2893_v49  ;;  %v2109_v58 = vpack.c.bf16 %v777_v56, %v770_v55  ;;  %v750_v63 = vld [vmem:[#allocation8 + $0x3c8] sm:$0xff]  ;;  %v791_v5 = vld [vmem:[#allocation8 + $0x510] sm:$0xff]  ;;  %v825_v42 = vld [vmem:[#allocation8 + $0x620] sm:$0xff] }
  0xa5   :  { %2044 = vmatpush1.bf16.msra.mxu1 %v2043_v16  ;;  %552 = vmatprep.mubr.f32.mxu1 %v2793_v0  ;;  %v673_v16 = vld [vmem:[#allocation8 + $0x160] sm:$0xff]  ;;  %v2231_v6 = vpack.c.bf16 %v750_v63, %v743_v62  ;;  %v2113_v7 = vpack.c.bf16 %v791_v5, %v784_v4  ;;  %v771_v21 = vld [vmem:[#allocation8 + $0x470] sm:$0xff]  ;;  %v826_v38 = vld [vmem:[#allocation8 + $0x628] sm:$0xff] }
  0xa6   :  { %2046 = vmatprep.subr.bf16.mxu1 %v2045_v17  ;;  %2100 = vmatpush1.bf16.msra.mxu0 %v2099_v30  ;;  %v680_v17 = vld [vmem:[#allocation8 + $0x198] sm:$0xff]  ;;  %v749_v30 = vld [vmem:[#allocation8 + $0x3c0] sm:$0xff]  ;;  %v807_v37 = vld [vmem:[#allocation8 + $0x590] sm:$0xff] }
  0xa7   :  { %v2101_v32 = vpack.c.bf16 %v749_v30, %v742_v29  ;;  %v811_v29 = vld [vmem:[#allocation8 + $0x5b0] sm:$0xff]  ;;  %v818_v30 = vld [vmem:[#allocation8 + $0x5e8] sm:$0xff]  ;;  %v832_v43 = vld [vmem:[#allocation8 + $0x658] sm:$0xff] }
  0xa8   :  { %v821_v50 = vld [vmem:[#allocation8 + $0x600] sm:$0xff]  ;;  %v840_v51 = vld [vmem:[#allocation8 + $0x698] sm:$0xff]  ;;  %v839_v55 = vld [vmem:[#allocation8 + $0x690] sm:$0xff] }
  0xa9   :  { %2048 = vmatpush1.bf16.msra.mxu1 %v2047_v26  ;;  %v708_v26 = vld [vmem:[#allocation8 + $0x278] sm:$0xff]  ;;  %2102 = vmatprep.subr.bf16.mxu0 %v2101_v32  ;;  %v785_v32 = vld [vmem:[#allocation8 + $0x4e0] sm:$0xff]  ;;  %v846_v56 = vld [vmem:[#allocation8 + $0x6c8] sm:$0xff] }
  0xaa   :  { %2050 = vmatprep.subr.bf16.mxu1 %v2049_v27  ;;  %v716_v27 = vld [vmem:[#allocation8 + $0x2b8] sm:$0xff]  ;;  %v2219_v31 = vpack.c.bf16 %v708_v26, %v701_v25  ;;  %v819_v26 = vld [vmem:[#allocation8 + $0x5f0] sm:$0xff]  ;;  %v854_v63 = vld [vmem:[#allocation8 + $0x708] sm:$0xff] }
  0xab   :  { %v2221_v35 = vpack.c.bf16 %v723_v28, %v716_v27  ;;  %v812_v25 = vld [vmem:[#allocation8 + $0x5b8] sm:$0xff]  ;;  %v835_v62 = vld [vmem:[#allocation8 + $0x670] sm:$0xff] }
  0xac   :  { %v2121_v28 = vpack.c.bf16 %v819_v26, %v812_v25  ;;  %v827_v5 = vld [vmem:[#allocation8 + $0x630] sm:$0xff] }
  0xad   :  { %2052 = vmatpush1.bf16.msra.mxu1 %v2051_v33  ;;  %v741_v33 = vld [vmem:[#allocation8 + $0x380] sm:$0xff] }
  0xae   :  { %2054 = vmatprep.subr.bf16.mxu1 %v2053_v34  ;;  %v748_v34 = vld [vmem:[#allocation8 + $0x3b8] sm:$0xff] }
  0xaf   :  { %v2103_v39 = vpack.c.bf16 %v748_v34, %v741_v33  ;;  %v792_v33 = vld [vmem:[#allocation8 + $0x518] sm:$0xff]  ;;  %v2123_v34 = vpack.c.bf16 %v818_v30, %v811_v29 }
  0xb1   :  { %2056 = vmatpush1.bf16.msra.mxu1 %v2055_v40  ;;  %v730_v40 = vld [vmem:[#allocation8 + $0x328] sm:$0xff]  ;;  %2104 = vmatpush1.bf16.msra.mxu0 %v2103_v39  ;;  %v833_v39 = vld [vmem:[#allocation8 + $0x660] sm:$0xff] }
  0xb2   :  { %2058 = vmatprep.subr.bf16.mxu1 %v2057_v41  ;;  %v737_v41 = vld [vmem:[#allocation8 + $0x360] sm:$0xff]  ;;  %2106 = vmatprep.subr.bf16.mxu0 %v2105_v45  ;;  %v799_v45 = vld [vmem:[#allocation8 + $0x550] sm:$0xff] }
  0xb3   :  { %v2225_v48 = vpack.c.bf16 %v737_v41, %v730_v40  ;;  %v2243_v40 = vpack.c.bf16 %v792_v33, %v785_v32  ;;  %v2125_v41 = vpack.c.bf16 %v833_v39, %v826_v38 }
  0xb5   :  { %2060 = vmatpush1.bf16.msra.mxu1 %v2059_v46  ;;  %v755_v46 = vld [vmem:[#allocation8 + $0x3f0] sm:$0xff] }
  0xb6   :  { %2062 = vmatprep.subr.bf16.mxu1 %v2061_v47  ;;  %v762_v47 = vld [vmem:[#allocation8 + $0x428] sm:$0xff] }
  0xb7   :  { %v2107_v52 = vpack.c.bf16 %v762_v47, %v755_v46  ;;  %v806_v46 = vld [vmem:[#allocation8 + $0x588] sm:$0xff]  ;;  %v2127_v47 = vpack.c.bf16 %v832_v43, %v825_v42 }
  0xb9   :  { %2064 = vmatpush1.bf16.msra.mxu1 %v2063_v53  ;;  %v744_v53 = vld [vmem:[#allocation8 + $0x398] sm:$0xff]  ;;  %2108 = vmatpush1.bf16.msra.mxu0 %v2107_v52  ;;  %v847_v52 = vld [vmem:[#allocation8 + $0x6d0] sm:$0xff] }
  0xba   :  { %2066 = vmatprep.subr.bf16.mxu1 %v2065_v54  ;;  %v751_v54 = vld [vmem:[#allocation8 + $0x3d0] sm:$0xff]  ;;  %2110 = vmatprep.subr.bf16.mxu0 %v2109_v58  ;;  %v813_v58 = vld [vmem:[#allocation8 + $0x5c0] sm:$0xff] }
  0xbb   :  { %v2229_v61 = vpack.c.bf16 %v751_v54, %v744_v53  ;;  %v2247_v53 = vpack.c.bf16 %v806_v46, %v799_v45  ;;  %v2129_v54 = vpack.c.bf16 %v847_v52, %v840_v51 }
  0xbd   :  { %2068 = vmatpush1.bf16.msra.mxu1 %v2067_v59  ;;  %v769_v59 = vld [vmem:[#allocation8 + $0x460] sm:$0xff] }
  0xbe   :  { %2198 = vmatprep.subr.bf16.mxu1 %v2197_v60  ;;  %v776_v60 = vld [vmem:[#allocation8 + $0x498] sm:$0xff] }
  0xbf   :  { %v2111_v1 = vpack.c.bf16 %v776_v60, %v769_v59  ;;  %v820_v59 = vld [vmem:[#allocation8 + $0x5f8] sm:$0xff]  ;;  %v2131_v60 = vpack.c.bf16 %v846_v56, %v839_v55 }
  0xc0   :  { %553 = vmatmul.mubr.f32.vlgmr.msra.gmra.mrb[8].mxu1 %v2890_v36  ;;  %v695_v36 = vld [vmem:[#allocation8 + $0x210] sm:$0xff] }
  0xc1   :  { %558 = vmatprep.mubr.f32.mxu1 %v2793_v0  ;;  %2200 = vmatpush1.bf16.msra.mxu1 %v2199_v2  ;;  %v2211_v0 = vpack.c.bf16 %v680_v17, %v673_v16  ;;  %v2213_v19 = vpack.c.bf16 %v695_v36, %v688_v18  ;;  %v758_v2 = vld [vmem:[#allocation8 + $0x408] sm:$0xff]  ;;  %v805_v17 = vld [vmem:[#allocation8 + $0x580] sm:$0xff]  ;;  %v2235_v18 = vpack.c.bf16 %v764_v12, %v757_v11  ;;  %v848_v12 = vld [vmem:[#allocation8 + $0x6d8] sm:$0xff] }
  0xc2   :  { %2202 = vmatprep.subr.bf16.mxu1 %v2201_v3  ;;  %v765_v3 = vld [vmem:[#allocation8 + $0x440] sm:$0xff]  ;;  %2112 = vmatpush1.bf16.msra.mxu0 %v2111_v1  ;;  %v798_v16 = vld [vmem:[#allocation8 + $0x548] sm:$0xff] }
  0xc3   :  { %v2233_v10 = vpack.c.bf16 %v765_v3, %v758_v2  ;;  %2114 = vmatprep.subr.bf16.mxu0 %v2113_v7  ;;  %v2117_v36 = vpack.c.bf16 %v805_v17, %v798_v16  ;;  %v861_v1 = vld [vmem:[#allocation8 + $0x740] sm:$0xff]  ;;  %v2251_v2 = vpack.c.bf16 %v820_v59, %v813_v58  ;;  %v842_v7 = vld [vmem:[#allocation8 + $0x6a8] sm:$0xff]  ;;  %v217_v17 = vlaneseq  ;;  %v860_v58 = vld [vmem:[#allocation8 + $0x738] sm:$0xff] }
  0xc4   :  { %559 = vmatmul.mubr.f32.gmra.mrb[10].mxu1 %v2893_v49  ;;  %v2217_v49 = vpack.c.bf16 %v709_v23, %v702_v22  ;;  %v778_v22 = vld [vmem:[#allocation8 + $0x4a8] sm:$0xff]  ;;  %v2133_v3 = vpack.c.bf16 %v861_v1, %v854_v63  ;;  %v841_v11 = vld [vmem:[#allocation8 + $0x6a0] sm:$0xff]  ;;  %v868_v63 = vld [vmem:[#allocation8 + $0x778] sm:$0xff] }
  0xc5   :  { %2204 = vmatpush1.bf16.msra.mxu1 %v2203_v8  ;;  %v783_v8 = vld [vmem:[#allocation8 + $0x4d0] sm:$0xff]  ;;  %v2239_v27 = vpack.c.bf16 %v778_v22, %v771_v21 }
  0xc6   :  { %2206 = vmatprep.subr.bf16.mxu1 %v2205_v9  ;;  %v790_v9 = vld [vmem:[#allocation8 + $0x508] sm:$0xff] }
  0xc7   :  { %v2115_v13 = vpack.c.bf16 %v790_v9, %v783_v8  ;;  %v849_v8 = vld [vmem:[#allocation8 + $0x6e0] sm:$0xff] }
  0xc9   :  { %2208 = vmatpush1.bf16.msra.mxu1 %v2207_v14  ;;  %v772_v14 = vld [vmem:[#allocation8 + $0x478] sm:$0xff]  ;;  %2116 = vmatpush1.bf16.msra.mxu0 %v2115_v13 }
  0xca   :  { %2210 = vmatprep.subr.bf16.mxu1 %v2209_v15  ;;  %v779_v15 = vld [vmem:[#allocation8 + $0x4b0] sm:$0xff]  ;;  %2118 = vmatprep.subr.bf16.mxu0 %v2117_v36  ;;  %v856_v13 = vld [vmem:[#allocation8 + $0x718] sm:$0xff] }
  0xcb   :  { %v2237_v20 = vpack.c.bf16 %v779_v15, %v772_v14  ;;  %v863_v14 = vld [vmem:[#allocation8 + $0x750] sm:$0xff]  ;;  %v2259_v15 = vpack.c.bf16 %v848_v12, %v841_v11 }
  0xcc   :  { %v2261_v16 = vpack.c.bf16 %v863_v14, %v856_v13  ;;  %v867_v12 = vld [vmem:[#allocation8 + $0x770] sm:$0xff]  ;;  %v874_v13 = vld [vmem:[#allocation8 + $0x7a8] sm:$0xff] }
  0xcd   :  { %2212 = vmatpush1.bf16.msra.mxu1 %v2211_v0  ;;  %v797_v0 = vld [vmem:[#allocation8 + $0x540] sm:$0xff] }
  0xce   :  { %2214 = vmatprep.subr.bf16.mxu1 %v2213_v19  ;;  %v804_v19 = vld [vmem:[#allocation8 + $0x578] sm:$0xff] }
  0xcf   :  { %v2119_v23 = vpack.c.bf16 %v804_v19, %v797_v0  ;;  %v2911_v0 = vld [vmem:[#allocation7] sm:$0xff] }
  0xd1   :  { %2216 = vmatpush1.bf16.msra.mxu1 %v2215_v24  ;;  %v786_v24 = vld [vmem:[#allocation8 + $0x4e8] sm:$0xff]  ;;  %2120 = vmatpush1.bf16.msra.mxu0 %v2119_v23 }
  0xd2   :  { %2218 = vmatprep.subr.bf16.mxu1 %v2217_v49  ;;  %v793_v49 = vld [vmem:[#allocation8 + $0x520] sm:$0xff]  ;;  %2122 = vmatprep.subr.bf16.mxu0 %v2121_v28 }
  0xd5   :  { %2220 = vmatpush1.bf16.msra.mxu1 %v2219_v31  ;;  %v2241_v31 = vpack.c.bf16 %v793_v49, %v786_v24  ;;  %2124 = vmatpush1.bf16.msra.mxu0 %v2123_v34 }
  0xd6   :  { %2222 = vmatprep.subr.bf16.mxu1 %v2221_v35  ;;  %v800_v35 = vld [vmem:[#allocation8 + $0x558] sm:$0xff]  ;;  %2126 = vmatprep.subr.bf16.mxu0 %v2125_v41 }
  0xd9   :  { %2224 = vmatpush1.bf16.msra.mxu1 %v2223_v44  ;;  %v2245_v44 = vpack.c.bf16 %v807_v37, %v800_v35  ;;  %2128 = vmatpush1.bf16.msra.mxu0 %v2127_v47 }
  0xda   :  { %2226 = vmatprep.subr.bf16.mxu1 %v2225_v48  ;;  %v814_v48 = vld [vmem:[#allocation8 + $0x5c8] sm:$0xff]  ;;  %2130 = vmatprep.subr.bf16.mxu0 %v2129_v54 }
  0xdd   :  { %2228 = vmatpush1.bf16.msra.mxu1 %v2227_v57  ;;  %v2249_v57 = vpack.c.bf16 %v821_v50, %v814_v48  ;;  %2132 = vmatpush1.bf16.msra.mxu0 %v2131_v60 }
  0xde   :  { %2230 = vmatprep.subr.bf16.mxu1 %v2229_v61  ;;  %v828_v61 = vld [vmem:[#allocation8 + $0x638] sm:$0xff]  ;;  %2134 = vmatprep.subr.bf16.mxu0 %v2133_v3  ;;  %v870_v3 = vld [vmem:[#allocation8 + $0x788] sm:$0xff] }
  0xdf   :  { %v2253_v4 = vpack.c.bf16 %v835_v62, %v828_v61  ;;  %v855_v61 = vld [vmem:[#allocation8 + $0x710] sm:$0xff]  ;;  %v862_v62 = vld [vmem:[#allocation8 + $0x748] sm:$0xff] }
  0xe0   :  { %v2263_v11 = vpack.c.bf16 %v862_v62, %v855_v61 }
  0xe1   :  { %2232 = vmatpush1.bf16.msra.mxu1 %v2231_v6  ;;  %v834_v6 = vld [vmem:[#allocation8 + $0x668] sm:$0xff] }
  0xe2   :  { %2234 = vmatprep.subr.bf16.mxu1 %v2233_v10  ;;  %v2255_v9 = vpack.c.bf16 %v834_v6, %v827_v5  ;;  %v2257_v10 = vpack.c.bf16 %v849_v8, %v842_v7 }
  0xe5   :  { %2236 = vmatpush1.bf16.msra.mxu1 %v2235_v18  ;;  %v2908_v18 = vshrl.u32 %v217_v17, 7 }
  0xe6   :  { %2238 = vmatprep.subr.bf16.mxu1 %v2237_v20 }
  0xe7   :  { %v219_v36 = vsub.s32 0, %v2908_v18  ;;  %v223_v19 = vsub.s32 1, %v2908_v18  ;;  %v235_v37 = vsub.s32 4, %v2908_v18  ;;  %v239_v39 = vsub.s32 5, %v2908_v18 }
  0xe8   :  { %v227_v54 = vsub.s32 2, %v2908_v18  ;;  %v231_v59 = vsub.s32 3, %v2908_v18 }
  0xe9   :  { %2240 = vmatpush1.bf16.msra.mxu1 %v2239_v27  ;;  %v220_v20 = vrot.slane %v2911_v0, %v219_v36  ;;  %v224_v21 = vrot.slane %v2911_v0, %v223_v19  ;;  %v240_v45 = vrot.slane %v2911_v0, %v239_v39 }
  0xea   :  { %2242 = vmatprep.subr.bf16.mxu1 %v2241_v31  ;;  %v228_v8 = vrot.slane %v2911_v0, %v227_v54  ;;  %v232_v14 = vrot.slane %v2911_v0, %v231_v59 }
  0xed   :  { %2244 = vmatpush1.bf16.msra.mxu1 %v2243_v40 }
  0xee   :  { %2246 = vmatprep.subr.bf16.mxu1 %v2245_v44  ;;  %v236_v44 = vrot.slane %v2911_v0, %v235_v37 }
  0xf1   :  { %2248 = vmatpush1.bf16.msra.mxu1 %v2247_v53 }
  0xf2   :  { %2250 = vmatprep.subr.bf16.mxu1 %v2249_v57  ;;  %v853_v57 = vld [vmem:[#allocation8 + $0x700] sm:$0xff] }
  0xf3   :  { %v2135_v7 = vpack.c.bf16 %v860_v58, %v853_v57  ;;  %v895_v57 = vld [vmem:[#allocation8 + $0x850] sm:$0xff]  ;;  %v902_v58 = vld [vmem:[#allocation8 + $0x888] sm:$0xff] }
  0xf5   :  { %2252 = vmatpush1.bf16.msra.mxu1 %v2251_v2  ;;  %v875_v2 = vld [vmem:[#allocation8 + $0x7b0] sm:$0xff] }
  0xf6   :  { %2254 = vmatprep.subr.bf16.mxu1 %v2253_v4  ;;  %v877_v4 = vld [vmem:[#allocation8 + $0x7c0] sm:$0xff] }
  0xf7   :  { %v2265_v17 = vpack.c.bf16 %v877_v4, %v870_v3  ;;  %v917_v4 = vld [vmem:[#allocation8 + $0x900] sm:$0xff] }
  0xf9   :  { %2256 = vmatpush1.bf16.msra.mxu1 %v2255_v9 }
  0xfa   :  { %2258 = vmatprep.subr.bf16.mxu1 %v2257_v10 }
  0xfd   :  { %2260 = vmatpush1.bf16.msra.mxu1 %v2259_v15 }
  0xfe   :  { %2262 = vmatprep.subr.bf16.mxu1 %v2261_v16  ;;  %v2137_v16 = vpack.c.bf16 %v875_v2, %v868_v63  ;;  %v897_v63 = vld [vmem:[#allocation8 + $0x860] sm:$0xff]  ;;  %v910_v2 = vld [vmem:[#allocation8 + $0x8c8] sm:$0xff] }
 0x153   :  { %v323_v22 = vpop.f32.mrb[0].mxu1 }
 0x154   :  { %v324_v23 = vadd.f32 %v323_v22, %v220_v20  ;;  %v325_v24 = vpop.f32.mrb[1].mxu1  ;;  %v882_v22 = vld [vmem:[#allocation8 + $0x7e8] sm:$0xff] }
 0x155   :  { %v326_v49 = vadd.f32 %v325_v24, %v224_v21  ;;  %v889_v24 = vld [vmem:[#allocation8 + $0x820] sm:$0xff] }
 0x156   :  { %v1843_v25 = vmul.f32 -1.442695, %v324_v23 }
 0x157   :  { %v1844_v26 = vmul.f32 -1.442695, %v326_v49  ;;  %v329_v27 = vpop.f32.mrb[2].mxu1  ;;  %v884_v49 = vld [vmem:[#allocation8 + $0x7f8] sm:$0xff] }
 0x158   :  { %2554 = vpow2.f32 %v1843_v25  ;;  %v330_v28 = vadd.f32 %v329_v27, %v220_v20  ;;  %v331_v29 = vpop.f32.mrb[3].mxu1  ;;  %v869_v20 = vld [vmem:[#allocation8 + $0x780] sm:$0xff]  ;;  %v891_v25 = vld [vmem:[#allocation8 + $0x830] sm:$0xff] }
 0x159   :  { %2556 = vpow2.f32 %v1844_v26  ;;  %v332_v30 = vadd.f32 %v331_v29, %v224_v21  ;;  %v876_v21 = vld [vmem:[#allocation8 + $0x7b8] sm:$0xff] }
 0x15a   :  { %v1847_v31 = vmul.f32 -1.442695, %v330_v28  ;;  %v2139_v28 = vpack.c.bf16 %v874_v13, %v867_v12  ;;  %v909_v12 = vld [vmem:[#allocation8 + $0x8c0] sm:$0xff]  ;;  %v916_v13 = vld [vmem:[#allocation8 + $0x8f8] sm:$0xff] }
 0x15b   :  { %v477_v32 = vpop.f32.mrb[0].mxu0  ;;  %v1848_v33 = vmul.f32 -1.442695, %v332_v30 }
 0x15c   :  { %v479_v34 = vpop.f32.mrb[1].mxu0  ;;  %2558 = vpow2.f32 %v1847_v31  ;;  %v478_v50 = vadd.f32 %v477_v32, %v236_v44  ;;  %v2267_v32 = vpack.c.bf16 %v876_v21, %v869_v20  ;;  %v924_v20 = vld [vmem:[#allocation8 + $0x938] sm:$0xff]  ;;  %v931_v21 = vld [vmem:[#allocation8 + $0x970] sm:$0xff] }
 0x15d   :  { %2560 = vpow2.f32 %v1848_v33  ;;  %v480_v52 = vadd.f32 %v479_v34, %v240_v45  ;;  %v881_v33 = vld [vmem:[#allocation8 + $0x7e0] sm:$0xff]  ;;  %v888_v34 = vld [vmem:[#allocation8 + $0x818] sm:$0xff] }
 0x15e   :  { %v613_v53 = vmax.f32 %v478_v50, 0.0 }
 0x15f   :  { %v483_v35 = vpop.f32.mrb[2].mxu0  ;;  %v614_v56 = vmax.f32 %v480_v52, 0.0 }
 0x160   :  { %v485_v38 = vpop.f32.mrb[3].mxu0  ;;  %v484_v55 = vadd.f32 %v483_v35, %v236_v44  ;;  %v896_v44 = vld [vmem:[#allocation8 + $0x858] sm:$0xff] }
 0x161   :  { %v486_v60 = vadd.f32 %v485_v38, %v240_v45 }
 0x162   :  { %v2555_v40 = vpop.eup %2554  ;;  %v617_v9 = vmax.f32 %v484_v55, 0.0  ;;  %v2143_v55 = vpack.c.bf16 %v888_v34, %v881_v33  ;;  %v945_v33 = vld [vmem:[#allocation8 + $0x9e0] sm:$0xff]  ;;  %v940_v34 = vld [vmem:[#allocation8 + $0x9b8] sm:$0xff] }
 0x163   :  { %v2557_v41 = vpop.eup %2556  ;;  %v589_v42 = vadd.f32 1.0, %v2555_v40  ;;  %v618_v15 = vmax.f32 %v486_v60, 0.0  ;;  %v2141_v40 = vpack.c.bf16 %v889_v24, %v882_v22  ;;  %v926_v22 = vld [vmem:[#allocation8 + $0x948] sm:$0xff]  ;;  %v2151_v24 = vpack.c.bf16 %v916_v13, %v909_v12 }
 0x164   :  { %v590_v43 = vadd.f32 1.0, %v2557_v41  ;;  %v2269_v41 = vpack.c.bf16 %v891_v25, %v884_v49  ;;  %v923_v25 = vld [vmem:[#allocation8 + $0x930] sm:$0xff] }
 0x165   :  { %2562 = vrcp.f32 %v589_v42  ;;  %v883_v42 = vld [vmem:[#allocation8 + $0x7f0] sm:$0xff] }
 0x166   :  { %v2559_v46 = vpop.eup %2558  ;;  %2564 = vrcp.f32 %v590_v43  ;;  %v890_v43 = vld [vmem:[#allocation8 + $0x828] sm:$0xff] }
 0x167   :  { %v2561_v47 = vpop.eup %2560  ;;  %v593_v48 = vadd.f32 1.0, %v2559_v46  ;;  %v903_v46 = vld [vmem:[#allocation8 + $0x890] sm:$0xff] }
 0x168   :  { %v594_v51 = vadd.f32 1.0, %v2561_v47  ;;  %v898_v47 = vld [vmem:[#allocation8 + $0x868] sm:$0xff]  ;;  %v2145_v61 = vpack.c.bf16 %v903_v46, %v896_v44  ;;  %v937_v44 = vld [vmem:[#allocation8 + $0x9a0] sm:$0xff] }
 0x169   :  { %2566 = vrcp.f32 %v593_v48  ;;  %v905_v48 = vld [vmem:[#allocation8 + $0x8a0] sm:$0xff] }
 0x16a   :  { %2568 = vrcp.f32 %v594_v51  ;;  %v2273_v62 = vpack.c.bf16 %v905_v48, %v898_v47  ;;  %v939_v48 = vld [vmem:[#allocation8 + $0x9b0] sm:$0xff] }
 0x16f   :  { %v2563_v1 = vpop.eup %2562 }
 0x170   :  { %v2565_v5 = vpop.eup %2564  ;;  %v2930_v6 = vmul.f32 %v2563_v1, %v613_v53  ;;  %v904_v1 = vld [vmem:[#allocation8 + $0x898] sm:$0xff] }
 0x171   :  { %v2935_v10 = vmul.f32 %v2565_v5, %v614_v56  ;;  %v2271_v56 = vpack.c.bf16 %v890_v43, %v883_v42  ;;  %v912_v5 = vld [vmem:[#allocation8 + $0x8d8] sm:$0xff] }
 0x173   :  { %v2567_v23 = vpop.eup %2566  ;;  %1178 = vmatprep.mubr.f32.mxu0 %v2935_v10  ;;  %1332 = vmatprep.mubr.f32.mxu1 %v2935_v10  ;;  %v400_v26 = vpop.f32.mrb[4].mxu1 }
 0x174   :  { %v2569_v27 = vpop.eup %2568  ;;  %1179 = vmatmul.mubr.f32.vlgmr.msra.gmra.mrb[4].mxu0 %v2930_v6  ;;  %1333 = vmatmul.mubr.f32.vlgmr.msra.gmra.mrb[12].mxu1 %v2930_v6  ;;  %v401_v29 = vadd.f32 %v400_v26, %v228_v8  ;;  %v402_v30 = vpop.f32.mrb[5].mxu1  ;;  %v2944_v31 = vmul.f32 %v2567_v23, %v617_v9  ;;  %v2147_v9 = vpack.c.bf16 %v902_v58, %v895_v57  ;;  %v933_v23 = vld [vmem:[#allocation8 + $0x980] sm:$0xff]  ;;  %v930_v26 = vld [vmem:[#allocation8 + $0x968] sm:$0xff] }
 0x175   :  { %2136 = vmatpush1.bf16.msra.mxu0 %v2135_v7  ;;  %2264 = vmatpush1.bf16.msra.mxu1 %v2263_v11  ;;  %v403_v35 = vadd.f32 %v402_v30, %v232_v14  ;;  %v2946_v38 = vmul.f32 %v2569_v27, %v618_v15  ;;  %v919_v7 = vld [vmem:[#allocation8 + $0x910] sm:$0xff]  ;;  %v2275_v11 = vpack.c.bf16 %v904_v1, %v897_v63  ;;  %v932_v30 = vld [vmem:[#allocation8 + $0x978] sm:$0xff]  ;;  %v958_v1 = vld [vmem:[#allocation8 + $0xa48] sm:$0xff] }
 0x176   :  { %2138 = vmatprep.subr.bf16.mxu0 %v2137_v16  ;;  %2266 = vmatprep.subr.bf16.mxu1 %v2265_v17  ;;  %v1845_v45 = vmul.f32 -1.442695, %v401_v29  ;;  %v2277_v15 = vpack.c.bf16 %v919_v7, %v912_v5  ;;  %v911_v16 = vld [vmem:[#allocation8 + $0x8d0] sm:$0xff]  ;;  %v918_v17 = vld [vmem:[#allocation8 + $0x908] sm:$0xff]  ;;  %v2153_v27 = vpack.c.bf16 %v931_v21, %v924_v20  ;;  %v925_v29 = vld [vmem:[#allocation8 + $0x940] sm:$0xff]  ;;  %v2155_v42 = vpack.c.bf16 %v930_v26, %v923_v25 }
 0x177   :  { %v1846_v50 = vmul.f32 -1.442695, %v403_v35  ;;  %v406_v51 = vpop.f32.mrb[6].mxu1  ;;  %1184 = vmatprep.mubr.f32.mxu0 %v2946_v38  ;;  %1338 = vmatprep.mubr.f32.mxu1 %v2946_v38  ;;  %v2279_v49 = vpack.c.bf16 %v918_v17, %v911_v16  ;;  %v947_v35 = vld [vmem:[#allocation8 + $0x9f0] sm:$0xff]  ;;  %v2283_v43 = vpack.c.bf16 %v932_v30, %v925_v29  ;;  %v960_v5 = vld [vmem:[#allocation8 + $0xa58] sm:$0xff]  ;;  %v966_v7 = vld [vmem:[#allocation8 + $0xa88] sm:$0xff] }
 0x178   :  { %v407_v52 = vadd.f32 %v406_v51, %v228_v8  ;;  %v408_v53 = vpop.f32.mrb[7].mxu1  ;;  %1185 = vmatmul.mubr.f32.gmra.mrb[6].mxu0 %v2944_v31  ;;  %1339 = vmatmul.mubr.f32.gmra.mrb[14].mxu1 %v2944_v31  ;;  %2570 = vpow2.f32 %v1845_v45  ;;  %v944_v45 = vld [vmem:[#allocation8 + $0x9d8] sm:$0xff]  ;;  %v2285_v47 = vpack.c.bf16 %v947_v35, %v940_v34  ;;  %v951_v63 = vld [vmem:[#allocation8 + $0xa10] sm:$0xff]  ;;  %v965_v17 = vld [vmem:[#allocation8 + $0xa80] sm:$0xff]  ;;  %v247_v21 = vsub.s32 7, %v2908_v18 }
 0x179   :  { %2140 = vmatpush1.bf16.msra.mxu0 %v2139_v28  ;;  %2268 = vmatpush1.bf16.msra.mxu1 %v2267_v32  ;;  %v409_v60 = vadd.f32 %v408_v53, %v232_v14  ;;  %2572 = vpow2.f32 %v1846_v50  ;;  %v2149_v14 = vpack.c.bf16 %v917_v4, %v910_v2  ;;  %v2281_v28 = vpack.c.bf16 %v933_v23, %v926_v22  ;;  %v938_v32 = vld [vmem:[#allocation8 + $0x9a8] sm:$0xff]  ;;  %v952_v51 = vld [vmem:[#allocation8 + $0xa18] sm:$0xff]  ;;  %v959_v53 = vld [vmem:[#allocation8 + $0xa50] sm:$0xff] }
 0x17a   :  { %2142 = vmatprep.subr.bf16.mxu0 %v2141_v40  ;;  %2270 = vmatprep.subr.bf16.mxu1 %v2269_v41  ;;  %v1849_v3 = vmul.f32 -1.442695, %v407_v52  ;;  %v2157_v46 = vpack.c.bf16 %v945_v33, %v938_v32  ;;  %v946_v50 = vld [vmem:[#allocation8 + $0x9e8] sm:$0xff]  ;;  %v2161_v2 = vpack.c.bf16 %v959_v53, %v952_v51  ;;  %v953_v4 = vld [vmem:[#allocation8 + $0xa20] sm:$0xff]  ;;  %v972_v20 = vld [vmem:[#allocation8 + $0xab8] sm:$0xff]  ;;  %v248_v35 = vrot.slane %v2911_v0, %v247_v21 }
 0x17b   :  { %v1850_v8 = vmul.f32 -1.442695, %v409_v60  ;;  %v2291_v16 = vpack.c.bf16 %v960_v5, %v953_v4  ;;  %v980_v25 = vld [vmem:[#allocation8 + $0xaf8] sm:$0xff]  ;;  %v987_v26 = vld [vmem:[#allocation8 + $0xb30] sm:$0xff]  ;;  %v2167_v30 = vpack.c.bf16 %v972_v20, %v965_v17  ;;  %v986_v34 = vld [vmem:[#allocation8 + $0xb28] sm:$0xff] }
 0x17c   :  { %2574 = vpow2.f32 %v1849_v3  ;;  %v979_v33 = vld [vmem:[#allocation8 + $0xaf0] sm:$0xff]  ;;  %v1010_v4 = vld [vmem:[#allocation8 + $0xbe8] sm:$0xff]  ;;  %v1017_v5 = vld [vmem:[#allocation8 + $0xc20] sm:$0xff] }
 0x17d   :  { %2144 = vmatpush1.bf16.msra.mxu0 %v2143_v55  ;;  %2272 = vmatpush1.bf16.msra.mxu1 %v2271_v56  ;;  %2576 = vpow2.f32 %v1850_v8  ;;  %v954_v55 = vld [vmem:[#allocation8 + $0xa28] sm:$0xff]  ;;  %v961_v56 = vld [vmem:[#allocation8 + $0xa60] sm:$0xff]  ;;  %v2171_v53 = vpack.c.bf16 %v986_v34, %v979_v33  ;;  %v1007_v17 = vld [vmem:[#allocation8 + $0xbd0] sm:$0xff] }
 0x17e   :  { %2146 = vmatprep.subr.bf16.mxu0 %v2145_v61  ;;  %2274 = vmatprep.subr.bf16.mxu1 %v2273_v62  ;;  %v2159_v61 = vpack.c.bf16 %v944_v45, %v937_v44  ;;  %v2287_v62 = vpack.c.bf16 %v946_v50, %v939_v48  ;;  %v2289_v3 = vpack.c.bf16 %v961_v56, %v954_v55  ;;  %v973_v8 = vld [vmem:[#allocation8 + $0xac0] sm:$0xff]  ;;  %v994_v44 = vld [vmem:[#allocation8 + $0xb68] sm:$0xff] }
 0x17f   :  { %v2165_v22 = vpack.c.bf16 %v973_v8, %v966_v7  ;;  %v1001_v45 = vld [vmem:[#allocation8 + $0xba0] sm:$0xff]  ;;  %v1014_v20 = vld [vmem:[#allocation8 + $0xc08] sm:$0xff] }
 0x180   :  { %v993_v56 = vld [vmem:[#allocation8 + $0xb60] sm:$0xff] }
 0x181   :  { %2148 = vmatpush1.bf16.msra.mxu0 %v2147_v9  ;;  %2276 = vmatpush1.bf16.msra.mxu1 %v2275_v11  ;;  %v968_v9 = vld [vmem:[#allocation8 + $0xa98] sm:$0xff]  ;;  %v975_v11 = vld [vmem:[#allocation8 + $0xad0] sm:$0xff] }
 0x182   :  { %2150 = vmatprep.subr.bf16.mxu0 %v2149_v14  ;;  %2278 = vmatprep.subr.bf16.mxu1 %v2277_v15  ;;  %v2571_v40 = vpop.eup %2570  ;;  %v243_v14 = vsub.s32 6, %v2908_v18  ;;  %v2163_v15 = vpack.c.bf16 %v958_v1, %v951_v63  ;;  %v2293_v23 = vpack.c.bf16 %v975_v11, %v968_v9  ;;  %v1002_v63 = vld [vmem:[#allocation8 + $0xba8] sm:$0xff]  ;;  %v1008_v1 = vld [vmem:[#allocation8 + $0xbd8] sm:$0xff] }
 0x183   :  { %v2573_v41 = vpop.eup %2572  ;;  %v591_v52 = vadd.f32 1.0, %v2571_v40  ;;  %v2169_v40 = vpack.c.bf16 %v987_v26, %v980_v25  ;;  %v1009_v25 = vld [vmem:[#allocation8 + $0xbe0] sm:$0xff]  ;;  %v1016_v26 = vld [vmem:[#allocation8 + $0xc18] sm:$0xff] }
 0x184   :  { %v592_v58 = vadd.f32 1.0, %v2573_v41  ;;  %v244_v29 = vrot.slane %v2911_v0, %v243_v14  ;;  %v1000_v0 = vld [vmem:[#allocation8 + $0xb98] sm:$0xff] }
 0x185   :  { %2152 = vmatpush1.bf16.msra.mxu0 %v2151_v24  ;;  %2280 = vmatpush1.bf16.msra.mxu1 %v2279_v49  ;;  %2578 = vrcp.f32 %v591_v52  ;;  %v967_v24 = vld [vmem:[#allocation8 + $0xa90] sm:$0xff]  ;;  %v974_v49 = vld [vmem:[#allocation8 + $0xac8] sm:$0xff]  ;;  %v2175_v9 = vpack.c.bf16 %v1000_v0, %v993_v56 }
 0x186   :  { %2154 = vmatprep.subr.bf16.mxu0 %v2153_v27  ;;  %2282 = vmatprep.subr.bf16.mxu1 %v2281_v28  ;;  %v2575_v57 = vpop.eup %2574  ;;  %2580 = vrcp.f32 %v592_v58  ;;  %v982_v27 = vld [vmem:[#allocation8 + $0xb08] sm:$0xff]  ;;  %v989_v28 = vld [vmem:[#allocation8 + $0xb40] sm:$0xff]  ;;  %v2295_v32 = vpack.c.bf16 %v974_v49, %v967_v24  ;;  %v2305_v49 = vpack.c.bf16 %v1017_v5, %v1010_v4  ;;  %v1035_v56 = vld [vmem:[#allocation8 + $0xcb0] sm:$0xff] }
 0x187   :  { %v2577_v60 = vpop.eup %2576  ;;  %v595_v12 = vadd.f32 1.0, %v2575_v57  ;;  %v2297_v41 = vpack.c.bf16 %v989_v28, %v982_v27  ;;  %v1022_v27 = vld [vmem:[#allocation8 + $0xc48] sm:$0xff]  ;;  %v1049_v5 = vld [vmem:[#allocation8 + $0xd20] sm:$0xff] }
 0x188   :  { %v596_v13 = vadd.f32 1.0, %v2577_v60  ;;  %v2173_v60 = vpack.c.bf16 %v1001_v45, %v994_v44  ;;  %v1042_v0 = vld [vmem:[#allocation8 + $0xce8] sm:$0xff] }
 0x189   :  { %2156 = vmatpush1.bf16.msra.mxu0 %v2155_v42  ;;  %2284 = vmatpush1.bf16.msra.mxu1 %v2283_v43  ;;  %2582 = vrcp.f32 %v595_v12  ;;  %v981_v42 = vld [vmem:[#allocation8 + $0xb00] sm:$0xff]  ;;  %v988_v43 = vld [vmem:[#allocation8 + $0xb38] sm:$0xff] }
 0x18a   :  { %2158 = vmatprep.subr.bf16.mxu0 %v2157_v46  ;;  %2286 = vmatprep.subr.bf16.mxu1 %v2285_v47  ;;  %2584 = vrcp.f32 %v596_v13  ;;  %v996_v46 = vld [vmem:[#allocation8 + $0xb78] sm:$0xff]  ;;  %v1003_v47 = vld [vmem:[#allocation8 + $0xbb0] sm:$0xff]  ;;  %v2299_v55 = vpack.c.bf16 %v988_v43, %v981_v42 }
 0x18b   :  { %v1028_v42 = vld [vmem:[#allocation8 + $0xc78] sm:$0xff] }
 0x18d   :  { %2160 = vmatpush1.bf16.msra.mxu0 %v2159_v61  ;;  %2288 = vmatpush1.bf16.msra.mxu1 %v2287_v62  ;;  %v2301_v61 = vpack.c.bf16 %v1003_v47, %v996_v46  ;;  %v995_v62 = vld [vmem:[#allocation8 + $0xb70] sm:$0xff]  ;;  %v1030_v47 = vld [vmem:[#allocation8 + $0xc88] sm:$0xff] }
 0x18e   :  { %2162 = vmatprep.subr.bf16.mxu0 %v2161_v2  ;;  %2290 = vmatprep.subr.bf16.mxu1 %v2289_v3  ;;  %v1015_v3 = vld [vmem:[#allocation8 + $0xc10] sm:$0xff] }
 0x18f   :  { %v2579_v52 = vpop.eup %2578  ;;  %v2177_v24 = vpack.c.bf16 %v1015_v3, %v1008_v1  ;;  %v1023_v46 = vld [vmem:[#allocation8 + $0xc50] sm:$0xff]  ;;  %v1052_v1 = vld [vmem:[#allocation8 + $0xd38] sm:$0xff]  ;;  %v2187_v3 = vpack.c.bf16 %v1042_v0, %v1035_v56  ;;  %v654_v0 = vld [vmem:[#allocation8 + $0xc8] sm:$0xff] }
 0x190   :  { %v2581_v58 = vpop.eup %2580  ;;  %v647_v56 = vld [vmem:[#allocation8 + $0x90] sm:$0xff] }
 0x191   :  { %2164 = vmatpush1.bf16.msra.mxu0 %v2163_v15  ;;  %2292 = vmatpush1.bf16.msra.mxu1 %v2291_v16  ;;  %v2303_v16 = vpack.c.bf16 %v1002_v63, %v995_v62  ;;  %v1050_v62 = vld [vmem:[#allocation8 + $0xd28] sm:$0xff]  ;;  %v1057_v63 = vld [vmem:[#allocation8 + $0xd60] sm:$0xff] }
 0x192   :  { %2166 = vmatprep.subr.bf16.mxu0 %v2165_v22  ;;  %2294 = vmatprep.subr.bf16.mxu1 %v2293_v23 }
 0x193   :  { %v554_v48 = vpop.f32.mrb[8].mxu1  ;;  %v2583_v15 = vpop.eup %2582 }
 0x194   :  { %v555_v50 = vadd.f32 %v554_v48, %v244_v29  ;;  %v556_v51 = vpop.f32.mrb[9].mxu1  ;;  %v2585_v23 = vpop.eup %2584  ;;  %v1036_v48 = vld [vmem:[#allocation8 + $0xcb8] sm:$0xff] }
 0x195   :  { %2168 = vmatpush1.bf16.msra.mxu0 %v2167_v30  ;;  %2296 = vmatpush1.bf16.msra.mxu1 %v2295_v32  ;;  %v557_v57 = vadd.f32 %v556_v51, %v248_v35  ;;  %v1024_v30 = vld [vmem:[#allocation8 + $0xc58] sm:$0xff]  ;;  %v1031_v32 = vld [vmem:[#allocation8 + $0xc90] sm:$0xff]  ;;  %v1038_v51 = vld [vmem:[#allocation8 + $0xcc8] sm:$0xff] }
 0x196   :  { %2170 = vmatprep.subr.bf16.mxu0 %v2169_v40  ;;  %2298 = vmatprep.subr.bf16.mxu1 %v2297_v41  ;;  %v615_v2 = vmax.f32 %v555_v50, 0.0  ;;  %v2307_v40 = vpack.c.bf16 %v1016_v26, %v1009_v25  ;;  %v1021_v41 = vld [vmem:[#allocation8 + $0xc40] sm:$0xff]  ;;  %v2309_v45 = vpack.c.bf16 %v1031_v32, %v1024_v30  ;;  %v1043_v50 = vld [vmem:[#allocation8 + $0xcf0] sm:$0xff] }
 0x197   :  { %v616_v7 = vmax.f32 %v557_v57, 0.0  ;;  %v560_v8 = vpop.f32.mrb[10].mxu1  ;;  %v2185_v57 = vpack.c.bf16 %v1043_v50, %v1036_v48  ;;  %v641_v30 = vld [vmem:[#allocation8 + $0x60] sm:$0xff]  ;;  %v747_v32 = vld [vmem:[#allocation8 + $0x3b0] sm:$0xff]  ;;  %v648_v48 = vld [vmem:[#allocation8 + $0x98] sm:$0xff] }
 0x198   :  { %v2958_v11 = vmul.f32 %v2579_v52, %v615_v2  ;;  %v561_v12 = vadd.f32 %v560_v8, %v244_v29  ;;  %v562_v13 = vpop.f32.mrb[11].mxu1  ;;  %v1029_v29 = vld [vmem:[#allocation8 + $0xc80] sm:$0xff]  ;;  %v1059_v2 = vld [vmem:[#allocation8 + $0xd70] sm:$0xff]  ;;  %v2189_v8 = vpack.c.bf16 %v1057_v63, %v1050_v62  ;;  %v662_v62 = vld [vmem:[#allocation8 + $0x108] sm:$0xff] }
 0x199   :  { %2172 = vmatpush1.bf16.msra.mxu0 %v2171_v53  ;;  %2300 = vmatpush1.bf16.msra.mxu1 %v2299_v55  ;;  %v2960_v21 = vmul.f32 %v2581_v58, %v616_v7  ;;  %v563_v22 = vadd.f32 %v562_v13, %v248_v35  ;;  %v2179_v35 = vpack.c.bf16 %v1014_v20, %v1007_v17  ;;  %v1045_v52 = vld [vmem:[#allocation8 + $0xd00] sm:$0xff]  ;;  %v1056_v7 = vld [vmem:[#allocation8 + $0xd58] sm:$0xff]  ;;  %v1058_v13 = vld [vmem:[#allocation8 + $0xd68] sm:$0xff] }
 0x19a   :  { %2174 = vmatprep.subr.bf16.mxu0 %v2173_v60  ;;  %2302 = vmatprep.subr.bf16.mxu1 %v2301_v61  ;;  %v619_v28 = vmax.f32 %v561_v12, 0.0  ;;  %v2181_v44 = vpack.c.bf16 %v1029_v29, %v1022_v27  ;;  %v2183_v53 = vpack.c.bf16 %v1028_v42, %v1021_v41  ;;  %v2311_v55 = vpack.c.bf16 %v1030_v47, %v1023_v46  ;;  %v1037_v60 = vld [vmem:[#allocation8 + $0xcc0] sm:$0xff]  ;;  %v1044_v61 = vld [vmem:[#allocation8 + $0xcf8] sm:$0xff]  ;;  %v1051_v12 = vld [vmem:[#allocation8 + $0xd30] sm:$0xff] }
 0x19b   :  { %1255 = vmatprep.mubr.f32.mxu0 %v2960_v21  ;;  %1409 = vmatprep.mubr.f32.mxu1 %v2960_v21  ;;  %v620_v33 = vmax.f32 %v563_v22, 0.0  ;;  %v2313_v58 = vpack.c.bf16 %v1045_v52, %v1038_v51  ;;  %v2315_v4 = vpack.c.bf16 %v1044_v61, %v1037_v60  ;;  %v1066_v17 = vld [vmem:[#allocation8 + $0xda8] sm:$0xff]  ;;  %v1073_v20 = vld [vmem:[#allocation8 + $0xde0] sm:$0xff]  ;;  %v2191_v22 = vpack.c.bf16 %v1056_v7, %v1049_v5  ;;  %v635_v46 = vld [vmem:[#allocation8 + $0x30] sm:$0xff] }
 0x19c   :  { %v2964_v34 = vmul.f32 %v2583_v15, %v619_v28  ;;  %v1064_v15 = vld [vmem:[#allocation8 + $0xd98] sm:$0xff]  ;;  %v2321_v26 = vpack.c.bf16 %v1073_v20, %v1066_v17  ;;  %v1065_v27 = vld [vmem:[#allocation8 + $0xda0] sm:$0xff]  ;;  %v634_v29 = vld [vmem:[#allocation8 + $0x28] sm:$0xff] }
 0x19d   :  { %2176 = vmatpush1.bf16.msra.mxu0 %v2175_v9  ;;  %2304 = vmatpush1.bf16.msra.mxu1 %v2303_v16  ;;  %v2966_v43 = vmul.f32 %v2585_v23, %v620_v33  ;;  %v2317_v9 = vpack.c.bf16 %v1059_v2, %v1052_v1  ;;  %v1071_v16 = vld [vmem:[#allocation8 + $0xdd0] sm:$0xff]  ;;  %v2319_v23 = vpack.c.bf16 %v1058_v13, %v1051_v12  ;;  %v1072_v28 = vld [vmem:[#allocation8 + $0xdd8] sm:$0xff]  ;;  %v754_v33 = vld [vmem:[#allocation8 + $0x3e8] sm:$0xff] }
 0x19e   :  { %2178 = vmatprep.subr.bf16.mxu0 %v2177_v24  ;;  %2306 = vmatprep.subr.bf16.mxu1 %v2305_v49  ;;  %v1063_v24 = vld [vmem:[#allocation8 + $0xd90] sm:$0xff]  ;;  %v1070_v49 = vld [vmem:[#allocation8 + $0xdc8] sm:$0xff]  ;;  %v2193_v25 = vpack.c.bf16 %v1071_v16, %v1064_v15  ;;  %v633_v41 = vld [vmem:[#allocation8 + $0x20] sm:$0xff]  ;;  %v2325_v42 = vpack.c.bf16 %v641_v30, %v634_v29 }
 0x19f   :  { %v642_v47 = vld [vmem:[#allocation8 + $0x68] sm:$0xff]  ;;  %v655_v50 = vld [vmem:[#allocation8 + $0xd0] sm:$0xff]  ;;  %v761_v51 = vld [vmem:[#allocation8 + $0x420] sm:$0xff] }
 0x1a0   :  { %v768_v52 = vld [vmem:[#allocation8 + $0x458] sm:$0xff]  ;;  %v649_v60 = vld [vmem:[#allocation8 + $0xa0] sm:$0xff]  ;;  %v775_v1 = vld [vmem:[#allocation8 + $0x490] sm:$0xff] }
 0x1a1   :  { %2180 = vmatpush1.bf16.msra.mxu0 %v2179_v35  ;;  %2308 = vmatpush1.bf16.msra.mxu1 %v2307_v40  ;;  %v2195_v35 = vpack.c.bf16 %v1070_v49, %v1063_v24  ;;  %v2323_v40 = vpack.c.bf16 %v1072_v28, %v1065_v27  ;;  %v656_v61 = vld [vmem:[#allocation8 + $0xd8] sm:$0xff]  ;;  %v669_v63 = vld [vmem:[#allocation8 + $0x140] sm:$0xff]  ;;  %v782_v2 = vld [vmem:[#allocation8 + $0x4c8] sm:$0xff] }
 0x1a2   :  { %2182 = vmatprep.subr.bf16.mxu0 %v2181_v44  ;;  %2310 = vmatprep.subr.bf16.mxu1 %v2309_v45  ;;  %v2453_v44 = vpack.c.bf16 %v754_v33, %v747_v32  ;;  %v640_v45 = vld [vmem:[#allocation8 + $0x58] sm:$0xff]  ;;  %v661_v5 = vld [vmem:[#allocation8 + $0x100] sm:$0xff]  ;;  %v2461_v12 = vpack.c.bf16 %v782_v2, %v775_v1  ;;  %v670_v13 = vld [vmem:[#allocation8 + $0x148] sm:$0xff] }
 0x1a3   :  { %v668_v7 = vld [vmem:[#allocation8 + $0x138] sm:$0xff]  ;;  %v683_v16 = vld [vmem:[#allocation8 + $0x1b0] sm:$0xff]  ;;  %v789_v17 = vld [vmem:[#allocation8 + $0x500] sm:$0xff] }
 0x1a4   :  { %v676_v15 = vld [vmem:[#allocation8 + $0x178] sm:$0xff]  ;;  %v675_v49 = vld [vmem:[#allocation8 + $0x170] sm:$0xff]  ;;  %v690_v29 = vld [vmem:[#allocation8 + $0x1e8] sm:$0xff] }
 0x1a5   :  { %2184 = vmatpush1.bf16.msra.mxu0 %v2183_v53  ;;  %2312 = vmatpush1.bf16.msra.mxu1 %v2311_v55  ;;  %v2327_v53 = vpack.c.bf16 %v640_v45, %v633_v41  ;;  %v2455_v55 = vpack.c.bf16 %v642_v47, %v635_v46  ;;  %v796_v20 = vld [vmem:[#allocation8 + $0x538] sm:$0xff]  ;;  %v2337_v24 = vpack.c.bf16 %v683_v16, %v676_v15  ;;  %v697_v30 = vld [vmem:[#allocation8 + $0x220] sm:$0xff]  ;;  %v803_v32 = vld [vmem:[#allocation8 + $0x570] sm:$0xff] }
 0x1a6   :  { %2186 = vmatprep.subr.bf16.mxu0 %v2185_v57  ;;  %2314 = vmatprep.subr.bf16.mxu1 %v2313_v58  ;;  %v2329_v57 = vpack.c.bf16 %v655_v50, %v648_v48  ;;  %v2457_v58 = vpack.c.bf16 %v768_v52, %v761_v51  ;;  %v2465_v27 = vpack.c.bf16 %v796_v20, %v789_v17  ;;  %v684_v28 = vld [vmem:[#allocation8 + $0x1b8] sm:$0xff]  ;;  %v810_v33 = vld [vmem:[#allocation8 + $0x5a8] sm:$0xff]  ;;  %v711_v48 = vld [vmem:[#allocation8 + $0x290] sm:$0xff] }
 0x1a7   :  { %v2341_v41 = vpack.c.bf16 %v697_v30, %v690_v29  ;;  %v2469_v45 = vpack.c.bf16 %v810_v33, %v803_v32  ;;  %v698_v46 = vld [vmem:[#allocation8 + $0x228] sm:$0xff]  ;;  %v704_v47 = vld [vmem:[#allocation8 + $0x258] sm:$0xff]  ;;  %v817_v50 = vld [vmem:[#allocation8 + $0x5e0] sm:$0xff] }
 0x1a8   :  { %v824_v51 = vld [vmem:[#allocation8 + $0x618] sm:$0xff]  ;;  %v838_v1 = vld [vmem:[#allocation8 + $0x688] sm:$0xff]  ;;  %v739_v15 = vld [vmem:[#allocation8 + $0x370] sm:$0xff] }
 0x1a9   :  { %2188 = vmatpush1.bf16.msra.mxu0 %v2187_v3  ;;  %2316 = vmatpush1.bf16.msra.mxu1 %v2315_v4  ;;  %v2331_v3 = vpack.c.bf16 %v654_v0, %v647_v56  ;;  %v2459_v4 = vpack.c.bf16 %v656_v61, %v649_v60  ;;  %v703_v56 = vld [vmem:[#allocation8 + $0x250] sm:$0xff]  ;;  %v710_v0 = vld [vmem:[#allocation8 + $0x288] sm:$0xff]  ;;  %v712_v60 = vld [vmem:[#allocation8 + $0x298] sm:$0xff] }
 0x1aa   :  { %2190 = vmatprep.subr.bf16.mxu0 %v2189_v8  ;;  %2318 = vmatprep.subr.bf16.mxu1 %v2317_v9  ;;  %v663_v8 = vld [vmem:[#allocation8 + $0x110] sm:$0xff]  ;;  %v2333_v9 = vpack.c.bf16 %v669_v63, %v662_v62  ;;  %v718_v61 = vld [vmem:[#allocation8 + $0x2c8] sm:$0xff]  ;;  %v725_v62 = vld [vmem:[#allocation8 + $0x300] sm:$0xff]  ;;  %v2347_v2 = vpack.c.bf16 %v710_v0, %v703_v56 }
 0x1ab   :  { %v831_v63 = vld [vmem:[#allocation8 + $0x650] sm:$0xff]  ;;  %v845_v16 = vld [vmem:[#allocation8 + $0x6c0] sm:$0xff]  ;;  %v852_v17 = vld [vmem:[#allocation8 + $0x6f8] sm:$0xff] }
 0x1ac   :  { %v753_v29 = vld [vmem:[#allocation8 + $0x3e0] sm:$0xff]  ;;  %v971_v30 = vld [vmem:[#allocation8 + $0xab0] sm:$0xff]  ;;  %v978_v32 = vld [vmem:[#allocation8 + $0xae8] sm:$0xff] }
 0x1ad   :  { %2192 = vmatpush1.bf16.msra.mxu0 %v2191_v22  ;;  %2320 = vmatpush1.bf16.msra.mxu1 %v2319_v23  ;;  %v2335_v22 = vpack.c.bf16 %v668_v7, %v661_v5  ;;  %v2463_v23 = vpack.c.bf16 %v670_v13, %v663_v8  ;;  %v717_v5 = vld [vmem:[#allocation8 + $0x2c0] sm:$0xff]  ;;  %v724_v7 = vld [vmem:[#allocation8 + $0x2f8] sm:$0xff]  ;;  %v719_v8 = vld [vmem:[#allocation8 + $0x2d0] sm:$0xff] }
 0x1ae   :  { %2194 = vmatprep.subr.bf16.mxu0 %v2193_v25  ;;  %2322 = vmatprep.subr.bf16.mxu1 %v2321_v26  ;;  %v682_v25 = vld [vmem:[#allocation8 + $0x1a8] sm:$0xff]  ;;  %v677_v26 = vld [vmem:[#allocation8 + $0x180] sm:$0xff]  ;;  %v732_v13 = vld [vmem:[#allocation8 + $0x338] sm:$0xff]  ;;  %v2351_v20 = vpack.c.bf16 %v724_v7, %v717_v5 }
 0x1af   :  { %v887_v5 = vld [vmem:[#allocation8 + $0x810] sm:$0xff] }
 0x1b1   :  { %2196 = vmatpush1.bf16.msra.mxu0 %v2195_v35  ;;  %2324 = vmatpush1.bf16.msra.mxu1 %v2323_v40  ;;  %v2339_v35 = vpack.c.bf16 %v682_v25, %v675_v49  ;;  %v2467_v40 = vpack.c.bf16 %v684_v28, %v677_v26  ;;  %v738_v49 = vld [vmem:[#allocation8 + $0x368] sm:$0xff]  ;;  %v733_v25 = vld [vmem:[#allocation8 + $0x340] sm:$0xff]  ;;  %v2481_v26 = vpack.c.bf16 %v852_v17, %v845_v16  ;;  %v1020_v16 = vld [vmem:[#allocation8 + $0xc38] sm:$0xff] }
 0x1b2   :  { %2326 = vmatprep.subr.bf16.mxu0 %v2325_v42  ;;  %2454 = vmatprep.subr.bf16.mxu1 %v2453_v44  ;;  %v696_v42 = vld [vmem:[#allocation8 + $0x218] sm:$0xff]  ;;  %v691_v44 = vld [vmem:[#allocation8 + $0x1f0] sm:$0xff]  ;;  %v746_v28 = vld [vmem:[#allocation8 + $0x3a8] sm:$0xff] }
 0x1b4   :  { %1256 = vmatmul.mubr.f32.vlgmr.msra.gmra.mrb[4].mxu0 %v2958_v11  ;;  %1410 = vmatmul.mubr.f32.vlgmr.msra.gmra.mrb[12].mxu1 %v2958_v11 }
 0x1b5   :  { %2328 = vmatpush1.bf16.msra.mxu0 %v2327_v53  ;;  %2456 = vmatpush3.bf16.msra.mxu1 %v2455_v55  ;;  %v2471_v53 = vpack.c.bf16 %v698_v46, %v691_v44  ;;  %v2345_v55 = vpack.c.bf16 %v711_v48, %v704_v47  ;;  %v859_v44 = vld [vmem:[#allocation8 + $0x730] sm:$0xff]  ;;  %v760_v46 = vld [vmem:[#allocation8 + $0x418] sm:$0xff]  ;;  %v985_v48 = vld [vmem:[#allocation8 + $0xb20] sm:$0xff] }
 0x1b6   :  { %1261 = vmatprep.mubr.f32.mxu0 %v2966_v43  ;;  %1415 = vmatprep.mubr.f32.mxu1 %v2966_v43  ;;  %v767_v47 = vld [vmem:[#allocation8 + $0x450] sm:$0xff] }
 0x1b7   :  { %2330 = vmatprep.subr.bf16.mxu0 %v2329_v57  ;;  %2458 = vmatprep.subr.bf16.mxu1 %v2457_v58  ;;  %v705_v57 = vld [vmem:[#allocation8 + $0x260] sm:$0xff]  ;;  %v2473_v58 = vpack.c.bf16 %v824_v51, %v817_v50  ;;  %v992_v50 = vld [vmem:[#allocation8 + $0xb58] sm:$0xff]  ;;  %v2361_v56 = vpack.c.bf16 %v767_v47, %v760_v46  ;;  %v823_v46 = vld [vmem:[#allocation8 + $0x610] sm:$0xff] }
 0x1b8   :  { %1262 = vmatmul.mubr.f32.gmra.mrb[6].mxu0 %v2964_v34  ;;  %1416 = vmatmul.mubr.f32.gmra.mrb[14].mxu1 %v2964_v34  ;;  %v2489_v0 = vpack.c.bf16 %v992_v50, %v985_v48  ;;  %v1041_v47 = vld [vmem:[#allocation8 + $0xce0] sm:$0xff]  ;;  %v1048_v48 = vld [vmem:[#allocation8 + $0xd18] sm:$0xff] }
 0x1b9   :  { %2332 = vmatpush1.bf16.msra.mxu0 %v2331_v3  ;;  %1486 = vmatprep.mubr.f32.mxu0 %v2935_v10  ;;  %v2475_v3 = vpack.c.bf16 %v712_v60, %v705_v57  ;;  %v873_v57 = vld [vmem:[#allocation8 + $0x7a0] sm:$0xff]  ;;  %v774_v60 = vld [vmem:[#allocation8 + $0x488] sm:$0xff] }
 0x1ba   :  { %2460 = vmatpush3.bf16.msra.mxu1 %v2459_v4  ;;  %1640 = vmatprep.mubr.f32.mxu1 %v2935_v10  ;;  %v689_v10 = vld [vmem:[#allocation8 + $0x1e0] sm:$0xff]  ;;  %v2349_v4 = vpack.c.bf16 %v725_v62, %v718_v61  ;;  %v999_v62 = vld [vmem:[#allocation8 + $0xb90] sm:$0xff] }
 0x1bb   :  { %2334 = vmatprep.subr.bf16.mxu0 %v2333_v9  ;;  %2462 = vmatprep.subr.bf16.mxu1 %v2461_v12  ;;  %v2343_v52 = vpack.c.bf16 %v696_v42, %v689_v10  ;;  %v2477_v9 = vpack.c.bf16 %v838_v1, %v831_v63  ;;  %v726_v12 = vld [vmem:[#allocation8 + $0x308] sm:$0xff]  ;;  %v752_v10 = vld [vmem:[#allocation8 + $0x3d8] sm:$0xff]  ;;  %v2485_v42 = vpack.c.bf16 %v978_v32, %v971_v30  ;;  %v781_v61 = vld [vmem:[#allocation8 + $0x4c0] sm:$0xff] }
 0x1bc   :  { %v1006_v63 = vld [vmem:[#allocation8 + $0xbc8] sm:$0xff]  ;;  %v2365_v7 = vpack.c.bf16 %v781_v61, %v774_v60  ;;  %v837_v60 = vld [vmem:[#allocation8 + $0x680] sm:$0xff]  ;;  %v1055_v61 = vld [vmem:[#allocation8 + $0xd50] sm:$0xff] }
 0x1bd   :  { %2336 = vmatpush1.bf16.msra.mxu0 %v2335_v22  ;;  %v2479_v22 = vpack.c.bf16 %v726_v12, %v719_v8  ;;  %v2493_v8 = vpack.c.bf16 %v1006_v63, %v999_v62  ;;  %v788_v12 = vld [vmem:[#allocation8 + $0x4f8] sm:$0xff]  ;;  %v1034_v30 = vld [vmem:[#allocation8 + $0xca8] sm:$0xff] }
 0x1be   :  { %2464 = vmatpush3.bf16.msra.mxu1 %v2463_v23  ;;  %2338 = vmatprep.subr.bf16.mxu0 %v2337_v24  ;;  %v2353_v23 = vpack.c.bf16 %v739_v15, %v732_v13  ;;  %v731_v24 = vld [vmem:[#allocation8 + $0x330] sm:$0xff]  ;;  %v1013_v15 = vld [vmem:[#allocation8 + $0xc00] sm:$0xff]  ;;  %v1062_v62 = vld [vmem:[#allocation8 + $0xd88] sm:$0xff] }
 0x1bf   :  { %2466 = vmatprep.subr.bf16.mxu1 %v2465_v27  ;;  %v740_v27 = vld [vmem:[#allocation8 + $0x378] sm:$0xff]  ;;  %v2355_v33 = vpack.c.bf16 %v738_v49, %v731_v24  ;;  %v795_v13 = vld [vmem:[#allocation8 + $0x530] sm:$0xff]  ;;  %v794_v24 = vld [vmem:[#allocation8 + $0x528] sm:$0xff] }
 0x1c0   :  { %v901_v49 = vld [vmem:[#allocation8 + $0x880] sm:$0xff] }
 0x1c1   :  { %2340 = vmatpush1.bf16.msra.mxu0 %v2339_v35  ;;  %v2483_v35 = vpack.c.bf16 %v740_v27, %v733_v25  ;;  %v2497_v25 = vpack.c.bf16 %v1020_v16, %v1013_v15  ;;  %v802_v27 = vld [vmem:[#allocation8 + $0x568] sm:$0xff]  ;;  %v1076_v15 = vld [vmem:[#allocation8 + $0xdf8] sm:$0xff] }
 0x1c2   :  { %2468 = vmatpush3.bf16.msra.mxu1 %v2467_v40  ;;  %2342 = vmatprep.subr.bf16.mxu0 %v2341_v41  ;;  %v2357_v40 = vpack.c.bf16 %v753_v29, %v746_v28  ;;  %v745_v41 = vld [vmem:[#allocation8 + $0x3a0] sm:$0xff]  ;;  %v1027_v29 = vld [vmem:[#allocation8 + $0xc70] sm:$0xff] }
 0x1c3   :  { %2470 = vmatprep.subr.bf16.mxu1 %v2469_v45  ;;  %v866_v45 = vld [vmem:[#allocation8 + $0x768] sm:$0xff]  ;;  %v2359_v51 = vpack.c.bf16 %v752_v10, %v745_v41  ;;  %v809_v28 = vld [vmem:[#allocation8 + $0x5a0] sm:$0xff]  ;;  %v808_v41 = vld [vmem:[#allocation8 + $0x598] sm:$0xff] }
 0x1c4   :  { %v915_v10 = vld [vmem:[#allocation8 + $0x8f0] sm:$0xff] }
 0x1c5   :  { %2344 = vmatpush1.bf16.msra.mxu0 %v2343_v52  ;;  %v2487_v52 = vpack.c.bf16 %v866_v45, %v859_v44  ;;  %v922_v44 = vld [vmem:[#allocation8 + $0x928] sm:$0xff]  ;;  %v816_v45 = vld [vmem:[#allocation8 + $0x5d8] sm:$0xff] }
 0x1c6   :  { %2472 = vmatpush3.bf16.msra.mxu1 %v2471_v53  ;;  %2346 = vmatprep.subr.bf16.mxu0 %v2345_v55  ;;  %v759_v53 = vld [vmem:[#allocation8 + $0x410] sm:$0xff]  ;;  %v766_v55 = vld [vmem:[#allocation8 + $0x448] sm:$0xff] }
 0x1c7   :  { %2474 = vmatprep.subr.bf16.mxu1 %v2473_v58  ;;  %v880_v58 = vld [vmem:[#allocation8 + $0x7d8] sm:$0xff]  ;;  %v2363_v1 = vpack.c.bf16 %v766_v55, %v759_v53  ;;  %v815_v53 = vld [vmem:[#allocation8 + $0x5d0] sm:$0xff]  ;;  %v822_v55 = vld [vmem:[#allocation8 + $0x608] sm:$0xff] }
 0x1c8   :  { %v2379_v63 = vpack.c.bf16 %v822_v55, %v815_v53  ;;  %v907_v53 = vld [vmem:[#allocation8 + $0x8b0] sm:$0xff] }
 0x1c9   :  { %2348 = vmatpush1.bf16.msra.mxu0 %v2347_v2  ;;  %v2491_v2 = vpack.c.bf16 %v880_v58, %v873_v57  ;;  %v936_v57 = vld [vmem:[#allocation8 + $0x998] sm:$0xff]  ;;  %v830_v58 = vld [vmem:[#allocation8 + $0x648] sm:$0xff]  ;;  %v899_v55 = vld [vmem:[#allocation8 + $0x870] sm:$0xff] }
 0x1ca   :  { %2476 = vmatpush3.bf16.msra.mxu1 %v2475_v3  ;;  %2350 = vmatprep.subr.bf16.mxu0 %v2349_v4  ;;  %v773_v3 = vld [vmem:[#allocation8 + $0x480] sm:$0xff]  ;;  %v780_v4 = vld [vmem:[#allocation8 + $0x4b8] sm:$0xff] }
 0x1cb   :  { %2478 = vmatprep.subr.bf16.mxu1 %v2477_v9  ;;  %v894_v9 = vld [vmem:[#allocation8 + $0x848] sm:$0xff]  ;;  %v2367_v17 = vpack.c.bf16 %v780_v4, %v773_v3  ;;  %v829_v3 = vld [vmem:[#allocation8 + $0x640] sm:$0xff]  ;;  %v836_v4 = vld [vmem:[#allocation8 + $0x678] sm:$0xff] }
 0x1cc   :  { %v2383_v16 = vpack.c.bf16 %v836_v4, %v829_v3  ;;  %v934_v3 = vld [vmem:[#allocation8 + $0x988] sm:$0xff] }
 0x1cd   :  { %2352 = vmatpush1.bf16.msra.mxu0 %v2351_v20  ;;  %v2495_v20 = vpack.c.bf16 %v894_v9, %v887_v5  ;;  %v943_v5 = vld [vmem:[#allocation8 + $0x9d0] sm:$0xff]  ;;  %v844_v9 = vld [vmem:[#allocation8 + $0x6b8] sm:$0xff]  ;;  %v942_v4 = vld [vmem:[#allocation8 + $0x9c8] sm:$0xff] }
 0x1ce   :  { %2480 = vmatpush3.bf16.msra.mxu1 %v2479_v22  ;;  %2354 = vmatprep.subr.bf16.mxu0 %v2353_v23  ;;  %v2369_v22 = vpack.c.bf16 %v795_v13, %v788_v12  ;;  %v787_v23 = vld [vmem:[#allocation8 + $0x4f0] sm:$0xff]  ;;  %v1069_v13 = vld [vmem:[#allocation8 + $0xdc0] sm:$0xff] }
 0x1cf   :  { %2482 = vmatprep.subr.bf16.mxu1 %v2481_v26  ;;  %v908_v26 = vld [vmem:[#allocation8 + $0x8b8] sm:$0xff]  ;;  %v2371_v32 = vpack.c.bf16 %v794_v24, %v787_v23  ;;  %v851_v12 = vld [vmem:[#allocation8 + $0x6f0] sm:$0xff]  ;;  %v850_v23 = vld [vmem:[#allocation8 + $0x6e8] sm:$0xff] }
 0x1d0   :  { %v957_v24 = vld [vmem:[#allocation8 + $0xa40] sm:$0xff] }
 0x1d1   :  { %2356 = vmatpush1.bf16.msra.mxu0 %v2355_v33  ;;  %v2499_v33 = vpack.c.bf16 %v908_v26, %v901_v49  ;;  %v2513_v49 = vpack.c.bf16 %v1076_v15, %v1069_v13  ;;  %v858_v26 = vld [vmem:[#allocation8 + $0x728] sm:$0xff]  ;;  %v956_v13 = vld [vmem:[#allocation8 + $0xa38] sm:$0xff]  ;;  %v963_v15 = vld [vmem:[#allocation8 + $0xa70] sm:$0xff] }
 0x1d2   :  { %2484 = vmatpush3.bf16.msra.mxu1 %v2483_v35  ;;  %2358 = vmatprep.subr.bf16.mxu0 %v2357_v40  ;;  %v2373_v35 = vpack.c.bf16 %v809_v28, %v802_v27  ;;  %v801_v40 = vld [vmem:[#allocation8 + $0x560] sm:$0xff] }
 0x1d3   :  { %2486 = vmatprep.subr.bf16.mxu1 %v2485_v42  ;;  %v2501_v42 = vpack.c.bf16 %v1034_v30, %v1027_v29  ;;  %v2375_v50 = vpack.c.bf16 %v808_v41, %v801_v40  ;;  %v865_v27 = vld [vmem:[#allocation8 + $0x760] sm:$0xff]  ;;  %v879_v40 = vld [vmem:[#allocation8 + $0x7d0] sm:$0xff] }
 0x1d4   :  { %v2389_v30 = vpack.c.bf16 %v865_v27, %v858_v26  ;;  %v969_v26 = vld [vmem:[#allocation8 + $0xaa0] sm:$0xff]  ;;  %v976_v27 = vld [vmem:[#allocation8 + $0xad8] sm:$0xff] }
 0x1d5   :  { %1641 = vmatmul.mubr.f32.vlgmr.msra.gmra.mrb[16].mxu1 %v2930_v6  ;;  %2360 = vmatpush1.bf16.msra.mxu0 %v2359_v51  ;;  %v2503_v51 = vpack.c.bf16 %v922_v44, %v915_v10  ;;  %v878_v44 = vld [vmem:[#allocation8 + $0x7c8] sm:$0xff] }
 0x1d6   :  { %1645 = vmatprep.mubr.f32.mxu1 %v2946_v38  ;;  %2488 = vmatpush3.bf16.msra.mxu1 %v2487_v52  ;;  %v2377_v52 = vpack.c.bf16 %v823_v46, %v816_v45  ;;  %v886_v45 = vld [vmem:[#allocation8 + $0x808] sm:$0xff]  ;;  %v893_v46 = vld [vmem:[#allocation8 + $0x840] sm:$0xff] }
 0x1d7   :  { %2362 = vmatprep.subr.bf16.mxu0 %v2361_v56  ;;  %2490 = vmatprep.subr.bf16.mxu1 %v2489_v0  ;;  %v929_v56 = vld [vmem:[#allocation8 + $0x960] sm:$0xff]  ;;  %v2505_v0 = vpack.c.bf16 %v1048_v48, %v1041_v47  ;;  %v2397_v48 = vpack.c.bf16 %v893_v46, %v886_v45  ;;  %v1004_v45 = vld [vmem:[#allocation8 + $0xbb8] sm:$0xff] }
 0x1d8   :  { %v1012_v46 = vld [vmem:[#allocation8 + $0xbf8] sm:$0xff] }
 0x1d9   :  { %1646 = vmatmul.mubr.f32.gmra.mrb[18].mxu1 %v2944_v31  ;;  %2364 = vmatpush1.bf16.msra.mxu0 %v2363_v1  ;;  %v2507_v1 = vpack.c.bf16 %v936_v57, %v929_v56  ;;  %v906_v56 = vld [vmem:[#allocation8 + $0x8a8] sm:$0xff]  ;;  %v921_v57 = vld [vmem:[#allocation8 + $0x920] sm:$0xff] }
 0x1da   :  { %2492 = vmatpush3.bf16.msra.mxu1 %v2491_v2  ;;  %1715 = vmatprep.mubr.f32.mxu1 %v2960_v21  ;;  %v2381_v2 = vpack.c.bf16 %v837_v60, %v830_v58  ;;  %v2403_v58 = vpack.c.bf16 %v906_v56, %v899_v55  ;;  %v1025_v56 = vld [vmem:[#allocation8 + $0xc60] sm:$0xff] }
 0x1db   :  { %2366 = vmatprep.subr.bf16.mxu0 %v2365_v7  ;;  %2494 = vmatprep.subr.bf16.mxu1 %v2493_v8  ;;  %v2509_v7 = vpack.c.bf16 %v1062_v62, %v1055_v61  ;;  %v950_v8 = vld [vmem:[#allocation8 + $0xa08] sm:$0xff]  ;;  %v913_v61 = vld [vmem:[#allocation8 + $0x8e0] sm:$0xff]  ;;  %v928_v62 = vld [vmem:[#allocation8 + $0x958] sm:$0xff] }
 0x1dd   :  { %2368 = vmatpush1.bf16.msra.mxu0 %v2367_v17  ;;  %v2511_v17 = vpack.c.bf16 %v950_v8, %v943_v5  ;;  %v949_v5 = vld [vmem:[#allocation8 + $0xa00] sm:$0xff] }
 0x1de   :  { %2496 = vmatpush3.bf16.msra.mxu1 %v2495_v20  ;;  %2370 = vmatprep.subr.bf16.mxu0 %v2369_v22  ;;  %v2385_v20 = vpack.c.bf16 %v851_v12, %v844_v9  ;;  %v843_v22 = vld [vmem:[#allocation8 + $0x6b0] sm:$0xff]  ;;  %v2413_v8 = vpack.c.bf16 %v949_v5, %v942_v4  ;;  %v941_v9 = vld [vmem:[#allocation8 + $0x9c0] sm:$0xff]  ;;  %v948_v12 = vld [vmem:[#allocation8 + $0x9f8] sm:$0xff] }
 0x1df   :  { %2498 = vmatprep.subr.bf16.mxu1 %v2497_v25  ;;  %v964_v25 = vld [vmem:[#allocation8 + $0xa78] sm:$0xff]  ;;  %v2387_v28 = vpack.c.bf16 %v850_v23, %v843_v22  ;;  %v962_v22 = vld [vmem:[#allocation8 + $0xa68] sm:$0xff] }
 0x1e0   :  { %v2515_v29 = vpack.c.bf16 %v964_v25, %v957_v24  ;;  %v970_v23 = vld [vmem:[#allocation8 + $0xaa8] sm:$0xff]  ;;  %v977_v24 = vld [vmem:[#allocation8 + $0xae0] sm:$0xff]  ;;  %v1060_v4 = vld [vmem:[#allocation8 + $0xd78] sm:$0xff] }
 0x1e1   :  { %2372 = vmatpush1.bf16.msra.mxu0 %v2371_v32  ;;  %v857_v32 = vld [vmem:[#allocation8 + $0x720] sm:$0xff]  ;;  %v2421_v25 = vpack.c.bf16 %v977_v24, %v970_v23  ;;  %v1068_v5 = vld [vmem:[#allocation8 + $0xdb8] sm:$0xff] }
 0x1e2   :  { %2500 = vmatpush3.bf16.msra.mxu1 %v2499_v33  ;;  %2374 = vmatprep.subr.bf16.mxu0 %v2373_v35  ;;  %v864_v33 = vld [vmem:[#allocation8 + $0x758] sm:$0xff] }
 0x1e3   :  { %2502 = vmatprep.subr.bf16.mxu1 %v2501_v42  ;;  %v872_v35 = vld [vmem:[#allocation8 + $0x798] sm:$0xff]  ;;  %v2391_v41 = vpack.c.bf16 %v864_v33, %v857_v32  ;;  %v871_v42 = vld [vmem:[#allocation8 + $0x790] sm:$0xff] }
 0x1e4   :  { %v2393_v10 = vpack.c.bf16 %v879_v40, %v872_v35  ;;  %v2395_v47 = vpack.c.bf16 %v878_v44, %v871_v42  ;;  %v983_v33 = vld [vmem:[#allocation8 + $0xb10] sm:$0xff]  ;;  %v990_v35 = vld [vmem:[#allocation8 + $0xb48] sm:$0xff]  ;;  %v997_v44 = vld [vmem:[#allocation8 + $0xb80] sm:$0xff] }
 0x1e5   :  { %2376 = vmatpush1.bf16.msra.mxu0 %v2375_v50  ;;  %v885_v50 = vld [vmem:[#allocation8 + $0x800] sm:$0xff]  ;;  %v998_v40 = vld [vmem:[#allocation8 + $0xb88] sm:$0xff] }
 0x1e6   :  { %2504 = vmatpush3.bf16.msra.mxu1 %v2503_v51  ;;  %2378 = vmatprep.subr.bf16.mxu0 %v2377_v52  ;;  %v892_v51 = vld [vmem:[#allocation8 + $0x838] sm:$0xff] }
 0x1e7   :  { %2506 = vmatprep.subr.bf16.mxu1 %v2505_v0  ;;  %v900_v52 = vld [vmem:[#allocation8 + $0x878] sm:$0xff]  ;;  %v914_v0 = vld [vmem:[#allocation8 + $0x8e8] sm:$0xff] }
 0x1e8   :  { %v2405_v60 = vpack.c.bf16 %v921_v57, %v914_v0  ;;  %v1032_v0 = vld [vmem:[#allocation8 + $0xc98] sm:$0xff] }
 0x1e9   :  { %2380 = vmatpush1.bf16.msra.mxu0 %v2379_v63  ;;  %v935_v63 = vld [vmem:[#allocation8 + $0x990] sm:$0xff]  ;;  %v1040_v57 = vld [vmem:[#allocation8 + $0xcd8] sm:$0xff] }
 0x1ea   :  { %2508 = vmatpush3.bf16.msra.mxu1 %v2507_v1  ;;  %2382 = vmatprep.subr.bf16.mxu0 %v2381_v2  ;;  %v927_v2 = vld [vmem:[#allocation8 + $0x950] sm:$0xff] }
 0x1eb   :  { %2510 = vmatprep.subr.bf16.mxu1 %v2509_v7  ;;  %v2411_v7 = vpack.c.bf16 %v934_v3, %v927_v2  ;;  %v1053_v3 = vld [vmem:[#allocation8 + $0xd40] sm:$0xff] }
 0x1ed   :  { %2384 = vmatpush1.bf16.msra.mxu0 %v2383_v16  ;;  %v2415_v16 = vpack.c.bf16 %v948_v12, %v941_v9  ;;  %v1067_v12 = vld [vmem:[#allocation8 + $0xdb0] sm:$0xff] }
 0x1ee   :  { %2512 = vmatpush3.bf16.msra.mxu1 %v2511_v17  ;;  %2386 = vmatprep.subr.bf16.mxu0 %v2385_v20  ;;  %v2417_v17 = vpack.c.bf16 %v963_v15, %v956_v13  ;;  %v955_v20 = vld [vmem:[#allocation8 + $0xa30] sm:$0xff]  ;;  %v1074_v13 = vld [vmem:[#allocation8 + $0xde8] sm:$0xff] }
 0x1ef   :  { %2514 = vmatprep.subr.bf16.mxu1 %v2513_v49  ;;  %v2419_v49 = vpack.c.bf16 %v962_v22, %v955_v20  ;;  %v2451_v15 = vpack.c.bf16 %v1074_v13, %v1067_v12 }
 0x1f1   :  { %2388 = vmatpush1.bf16.msra.mxu0 %v2387_v28  ;;  %v984_v28 = vld [vmem:[#allocation8 + $0xb18] sm:$0xff] }
 0x1f2   :  { %2516 = vmatpush3.bf16.msra.mxu1 %v2515_v29  ;;  %2390 = vmatprep.subr.bf16.mxu0 %v2389_v30  ;;  %v991_v29 = vld [vmem:[#allocation8 + $0xb50] sm:$0xff]  ;;  %v2423_v30 = vpack.c.bf16 %v976_v27, %v969_v26 }
 0x1f3   :  { %v2425_v32 = vpack.c.bf16 %v991_v29, %v984_v28 }
 0x1f4   :  { %1487 = vmatmul.mubr.f32.vlgmr.msra.gmra.mrb[8].mxu0 %v2930_v6  ;;  %v2399_v6 = vpack.c.bf16 %v892_v51, %v885_v50  ;;  %v1011_v51 = vld [vmem:[#allocation8 + $0xbf0] sm:$0xff] }
 0x1f5   :  { %1716 = vmatmul.mubr.f32.vlgmr.msra.gmra.mrb[20].mxu1 %v2958_v11  ;;  %1492 = vmatprep.mubr.f32.mxu0 %v2946_v38  ;;  %v2401_v38 = vpack.c.bf16 %v907_v53, %v900_v52  ;;  %v1018_v52 = vld [vmem:[#allocation8 + $0xc28] sm:$0xff] }
 0x1f6   :  { %2392 = vmatpush1.bf16.msra.mxu0 %v2391_v41  ;;  %1720 = vmatprep.mubr.f32.mxu1 %v2966_v43  ;;  %v1005_v41 = vld [vmem:[#allocation8 + $0xbc0] sm:$0xff]  ;;  %v1026_v53 = vld [vmem:[#allocation8 + $0xc68] sm:$0xff] }
 0x1f7   :  { %2394 = vmatprep.subr.bf16.mxu0 %v2393_v10  ;;  %v2427_v10 = vpack.c.bf16 %v990_v35, %v983_v33  ;;  %v2429_v42 = vpack.c.bf16 %v1005_v41, %v998_v40 }
 0x1f8   :  { %1493 = vmatmul.mubr.f32.gmra.mrb[10].mxu0 %v2944_v31  ;;  %v920_v31 = vld [vmem:[#allocation8 + $0x918] sm:$0xff] }
 0x1f9   :  { %1721 = vmatmul.mubr.f32.gmra.mrb[22].mxu1 %v2964_v34  ;;  %1563 = vmatprep.mubr.f32.mxu0 %v2960_v21  ;;  %v2407_v1 = vpack.c.bf16 %v920_v31, %v913_v61  ;;  %v2409_v21 = vpack.c.bf16 %v935_v63, %v928_v62  ;;  %v1039_v31 = vld [vmem:[#allocation8 + $0xcd0] sm:$0xff]  ;;  %v1046_v62 = vld [vmem:[#allocation8 + $0xd08] sm:$0xff] }
 0x1fa   :  { %2396 = vmatpush1.bf16.msra.mxu0 %v2395_v47  ;;  %v1019_v47 = vld [vmem:[#allocation8 + $0xc30] sm:$0xff]  ;;  %v1054_v63 = vld [vmem:[#allocation8 + $0xd48] sm:$0xff] }
 0x1fb   :  { %2398 = vmatprep.subr.bf16.mxu0 %v2397_v48  ;;  %v2431_v48 = vpack.c.bf16 %v1004_v45, %v997_v44  ;;  %v2433_v50 = vpack.c.bf16 %v1019_v47, %v1012_v46 }
 0x1fe   :  { %2400 = vmatpush1.bf16.msra.mxu0 %v2399_v6  ;;  %v1033_v6 = vld [vmem:[#allocation8 + $0xca0] sm:$0xff] }
 0x1ff   :  { %2402 = vmatprep.subr.bf16.mxu0 %v2401_v38  ;;  %v2435_v38 = vpack.c.bf16 %v1018_v52, %v1011_v51  ;;  %v2437_v55 = vpack.c.bf16 %v1033_v6, %v1026_v53 }
 0x202   :  { %2404 = vmatpush1.bf16.msra.mxu0 %v2403_v58  ;;  %v1047_v58 = vld [vmem:[#allocation8 + $0xd10] sm:$0xff] }
 0x203   :  { %2406 = vmatprep.subr.bf16.mxu0 %v2405_v60  ;;  %v2439_v60 = vpack.c.bf16 %v1032_v0, %v1025_v56  ;;  %v2441_v61 = vpack.c.bf16 %v1047_v58, %v1040_v57 }
 0x206   :  { %2408 = vmatpush1.bf16.msra.mxu0 %v2407_v1  ;;  %v1061_v1 = vld [vmem:[#allocation8 + $0xd80] sm:$0xff] }
 0x207   :  { %2410 = vmatprep.subr.bf16.mxu0 %v2409_v21  ;;  %v2443_v21 = vpack.c.bf16 %v1046_v62, %v1039_v31  ;;  %v2445_v2 = vpack.c.bf16 %v1061_v1, %v1054_v63 }
 0x20a   :  { %2412 = vmatpush1.bf16.msra.mxu0 %v2411_v7  ;;  %v1075_v7 = vld [vmem:[#allocation8 + $0xdf0] sm:$0xff] }
 0x20b   :  { %2414 = vmatprep.subr.bf16.mxu0 %v2413_v8  ;;  %v2447_v8 = vpack.c.bf16 %v1060_v4, %v1053_v3  ;;  %v2449_v9 = vpack.c.bf16 %v1075_v7, %v1068_v5 }
 0x20e   :  { %2416 = vmatpush1.bf16.msra.mxu0 %v2415_v16  ;;  %v2990_v16 = vld [vmem:[#allocation10] sm:$0xff] }
 0x20f   :  { %2418 = vmatprep.subr.bf16.mxu0 %v2417_v17  ;;  %v1082_v17 = vrot.slane %v2990_v16, %v219_v36  ;;  %v1090_v20 = vrot.slane %v2990_v16, %v227_v54  ;;  %v1086_v22 = vrot.slane %v2990_v16, %v223_v19 }
 0x212   :  { %2420 = vmatpush1.bf16.msra.mxu0 %v2419_v49 }
 0x213   :  { %2422 = vmatprep.subr.bf16.mxu0 %v2421_v25 }
 0x216   :  { %2424 = vmatpush1.bf16.msra.mxu0 %v2423_v30 }
 0x217   :  { %2426 = vmatprep.subr.bf16.mxu0 %v2425_v32 }
 0x21a   :  { %2428 = vmatpush1.bf16.msra.mxu0 %v2427_v10 }
 0x21b   :  { %2430 = vmatprep.subr.bf16.mxu0 %v2429_v42 }
 0x21e   :  { %2432 = vmatpush1.bf16.msra.mxu0 %v2431_v48 }
 0x21f   :  { %2434 = vmatprep.subr.bf16.mxu0 %v2433_v50 }
 0x222   :  { %2436 = vmatpush1.bf16.msra.mxu0 %v2435_v38 }
 0x223   :  { %2438 = vmatprep.subr.bf16.mxu0 %v2437_v55 }
 0x226   :  { %2440 = vmatpush1.bf16.msra.mxu0 %v2439_v60 }
 0x227   :  { %2442 = vmatprep.subr.bf16.mxu0 %v2441_v61 }
 0x22a   :  { %2444 = vmatpush1.bf16.msra.mxu0 %v2443_v21 }
 0x22b   :  { %2446 = vmatprep.subr.bf16.mxu0 %v2445_v2 }
 0x22e   :  { %2448 = vmatpush1.bf16.msra.mxu0 %v2447_v8 }
 0x22f   :  { %2450 = vmatprep.subr.bf16.mxu0 %v2449_v9 }
 0x232   :  { %2452 = vmatpush1.bf16.msra.mxu0 %v2451_v15  ;;  %v1106_v15 = vrot.slane %v2990_v16, %v243_v14 }
 0x235   :  { %1564 = vmatmul.mubr.f32.vlgmr.msra.gmra.mrb[8].mxu0 %v2958_v11  ;;  %v1094_v11 = vrot.slane %v2990_v16, %v231_v59 }
 0x236   :  { %1569 = vmatprep.mubr.f32.mxu0 %v2966_v43 }
 0x239   :  { %1570 = vmatmul.mubr.f32.gmra.mrb[10].mxu0 %v2964_v34 }
 0x287   :  { %v1257_v43 = vpop.f32.mrb[4].mxu0  ;;  %v1411_v34 = vpop.f32.mrb[12].mxu1 }
 0x288   :  { %v2517_v23 = vadd.f32 %v1257_v43, %v1082_v17  ;;  %v2521_v24 = vadd.f32 %v1411_v34, %v1090_v20  ;;  %v1259_v49 = vpop.f32.mrb[5].mxu0  ;;  %v1413_v25 = vpop.f32.mrb[13].mxu1 }
 0x289   :  { %v2518_v26 = vadd.f32 %v1259_v49, %v1086_v22  ;;  %v2522_v36 = vadd.f32 %v1413_v25, %v1094_v11 }
 0x28a   :  { %v1851_v27 = vmul.f32 -1.442695, %v2517_v23  ;;  %v1853_v28 = vmul.f32 -1.442695, %v2521_v24 }
 0x28b   :  { %v1852_v29 = vmul.f32 -1.442695, %v2518_v26  ;;  %v1854_v54 = vmul.f32 -1.442695, %v2522_v36  ;;  %v1263_v30 = vpop.f32.mrb[6].mxu0  ;;  %v1417_v32 = vpop.f32.mrb[14].mxu1 }
 0x28c   :  { %2586 = vpow2.f32 %v1851_v27  ;;  %v2519_v19 = vadd.f32 %v1263_v30, %v1082_v17  ;;  %v2523_v33 = vadd.f32 %v1417_v32, %v1090_v20  ;;  %v1265_v35 = vpop.f32.mrb[7].mxu0  ;;  %v1419_v40 = vpop.f32.mrb[15].mxu1  ;;  %v1098_v32 = vrot.slane %v2990_v16, %v235_v37 }
 0x28d   :  { %2588 = vpow2.f32 %v1853_v28  ;;  %v2520_v59 = vadd.f32 %v1265_v35, %v1086_v22  ;;  %v2524_v41 = vadd.f32 %v1419_v40, %v1094_v11 }
 0x28e   :  { %2590 = vpow2.f32 %v1852_v29  ;;  %v1858_v10 = vmul.f32 -1.442695, %v2519_v19  ;;  %v1860_v42 = vmul.f32 -1.442695, %v2523_v33  ;;  %v1102_v19 = vrot.slane %v2990_v16, %v239_v39 }
 0x28f   :  { %2592 = vpow2.f32 %v1854_v54  ;;  %v1859_v44 = vmul.f32 -1.442695, %v2520_v59  ;;  %v1861_v45 = vmul.f32 -1.442695, %v2524_v41 }
 0x290   :  { %2594 = vpow2.f32 %v1858_v10 }
 0x291   :  { %2596 = vpow2.f32 %v1860_v42 }
 0x292   :  { %2598 = vpow2.f32 %v1859_v44 }
 0x293   :  { %2600 = vpow2.f32 %v1861_v45 }
 0x296   :  { %v2587_v46 = vpop.eup %2586 }
 0x297   :  { %v2589_v47 = vpop.eup %2588  ;;  %v1768_v48 = vadd.f32 1.0, %v2587_v46 }
 0x298   :  { %v2591_v50 = vpop.eup %2590  ;;  %v1770_v51 = vadd.f32 1.0, %v2589_v47 }
 0x299   :  { %v2593_v52 = vpop.eup %2592  ;;  %2602 = vrcp.f32 %v1768_v48  ;;  %v1769_v53 = vadd.f32 1.0, %v2591_v50 }
 0x29a   :  { %v2595_v6 = vpop.eup %2594  ;;  %2604 = vrcp.f32 %v1770_v51  ;;  %v1771_v38 = vadd.f32 1.0, %v2593_v52 }
 0x29b   :  { %v2597_v55 = vpop.eup %2596  ;;  %2606 = vrcp.f32 %v1769_v53  ;;  %v1775_v56 = vadd.f32 1.0, %v2595_v6 }
 0x29c   :  { %v2599_v0 = vpop.eup %2598  ;;  %2608 = vrcp.f32 %v1771_v38  ;;  %v1777_v57 = vadd.f32 1.0, %v2597_v55 }
 0x29d   :  { %v2601_v58 = vpop.eup %2600  ;;  %2610 = vrcp.f32 %v1775_v56  ;;  %v1776_v60 = vadd.f32 1.0, %v2599_v0 }
 0x29e   :  { %2612 = vrcp.f32 %v1777_v57  ;;  %v1778_v61 = vadd.f32 1.0, %v2601_v58 }
 0x29f   :  { %2614 = vrcp.f32 %v1776_v60 }
 0x2a0   :  { %2616 = vrcp.f32 %v1778_v61 }
 0x2a3   :  { %v2603_v31 = vpop.eup %2602 }
 0x2a4   :  { %v2605_v62 = vpop.eup %2604  ;;  %1810 = vst [vmem:[#allocation11] sm:$0xff] %v2603_v31 }
 0x2a5   :  { %v2607_v63 = vpop.eup %2606  ;;  %1812 = vst [vmem:[#allocation11 + $0x10] sm:$0xff] %v2605_v62 }
 0x2a6   :  { %v2609_v1 = vpop.eup %2608  ;;  %1811 = vst [vmem:[#allocation11 + $0x8] sm:$0xff] %v2607_v63 }
 0x2a7   :  { %v2611_v21 = vpop.eup %2610  ;;  %1813 = vst [vmem:[#allocation11 + $0x18] sm:$0xff] %v2609_v1 }
 0x2a8   :  { %v2613_v2 = vpop.eup %2612  ;;  %1817 = vst [vmem:[#allocation11 + $0x38] sm:$0xff] %v2611_v21  ;;  %v1897_v3 = vpop.f32.mrb[16].mxu1 }
 0x2a9   :  { %v2615_v4 = vpop.eup %2614  ;;  %1819 = vst [vmem:[#allocation11 + $0x48] sm:$0xff] %v2613_v2  ;;  %v1898_v5 = vpop.f32.mrb[17].mxu1 }
 0x2aa   :  { %v2617_v7 = vpop.eup %2616  ;;  %1818 = vst [vmem:[#allocation11 + $0x40] sm:$0xff] %v2615_v4  ;;  %v1899_v8 = vadd.f32 %v1898_v5, %v1897_v3 }
 0x2ab   :  { %1820 = vst [vmem:[#allocation11 + $0x50] sm:$0xff] %v2617_v7 }
 0x2ac   :  { %v1900_v9 = vpop.f32.mrb[18].mxu1  ;;  %v1643_v22 = vadd.f32 %v1899_v8, %v1106_v15 }
 0x2ad   :  { %v1901_v12 = vpop.f32.mrb[19].mxu1 }
 0x2ae   :  { %v1902_v13 = vadd.f32 %v1901_v12, %v1900_v9 }
 0x2b0   :  { %v1648_v24 = vadd.f32 %v1902_v13, %v1106_v15 }
 0x2c8   :  { %v1935_v17 = vpop.f32.mrb[20].mxu1 }
 0x2c9   :  { %v1936_v20 = vpop.f32.mrb[21].mxu1 }
 0x2ca   :  { %v1937_v11 = vadd.f32 %v1936_v20, %v1935_v17 }
 0x2cc   :  { %v1718_v43 = vadd.f32 %v1937_v11, %v1643_v22  ;;  %v1938_v34 = vpop.f32.mrb[22].mxu1 }
 0x2cd   :  { %v1939_v23 = vpop.f32.mrb[23].mxu1 }
 0x2ce   :  { %v1857_v49 = vmul.f32 -1.442695, %v1718_v43  ;;  %v1940_v25 = vadd.f32 %v1939_v23, %v1938_v34 }
 0x2d0   :  { %2618 = vpow2.f32 %v1857_v49  ;;  %v1723_v26 = vadd.f32 %v1940_v25, %v1648_v24 }
 0x2d2   :  { %v1864_v36 = vmul.f32 -1.442695, %v1723_v26 }
 0x2d4   :  { %2620 = vpow2.f32 %v1864_v36 }
 0x2da   :  { %v2619_v27 = vpop.eup %2618 }
 0x2db   :  { %v1774_v28 = vadd.f32 1.0, %v2619_v27 }
 0x2dd   :  { %2622 = vrcp.f32 %v1774_v28 }
 0x2de   :  { %v2621_v29 = vpop.eup %2620 }
 0x2df   :  { %v1781_v54 = vadd.f32 1.0, %v2621_v29 }
 0x2e1   :  { %2624 = vrcp.f32 %v1781_v54 }
 0x2e7   :  { %v2623_v14 = vpop.eup %2622 }
 0x2e8   :  { %1816 = vst [vmem:[#allocation11 + $0x30] sm:$0xff] %v2623_v14 }
 0x2eb   :  { %v2625_v30 = vpop.eup %2624 }
 0x2ec   :  { %1823 = vst [vmem:[#allocation11 + $0x68] sm:$0xff] %v2625_v30 }
 0x308   :  { %v1565_v33 = vpop.f32.mrb[8].mxu0 }
 0x309   :  { %v2525_v35 = vadd.f32 %v1565_v33, %v1098_v32  ;;  %v1567_v40 = vpop.f32.mrb[9].mxu0 }
 0x30a   :  { %v2526_v59 = vadd.f32 %v1567_v40, %v1102_v19 }
 0x30b   :  { %v1855_v41 = vmul.f32 -1.442695, %v2525_v35 }
 0x30c   :  { %v1856_v10 = vmul.f32 -1.442695, %v2526_v59  ;;  %v1571_v42 = vpop.f32.mrb[10].mxu0 }
 0x30d   :  { %2626 = vpow2.f32 %v1855_v41  ;;  %v2527_v44 = vadd.f32 %v1571_v42, %v1098_v32  ;;  %v1573_v45 = vpop.f32.mrb[11].mxu0 }
 0x30e   :  { %2628 = vpow2.f32 %v1856_v10  ;;  %v2528_v46 = vadd.f32 %v1573_v45, %v1102_v19 }
 0x30f   :  { %v1862_v47 = vmul.f32 -1.442695, %v2527_v44 }
 0x310   :  { %v1863_v48 = vmul.f32 -1.442695, %v2528_v46 }
 0x311   :  { %2630 = vpow2.f32 %v1862_v47 }
 0x312   :  { %2632 = vpow2.f32 %v1863_v48 }
 0x317   :  { %v2627_v37 = vpop.eup %2626 }
 0x318   :  { %v2629_v18 = vpop.eup %2628  ;;  %v1772_v50 = vadd.f32 1.0, %v2627_v37 }
 0x319   :  { %v1773_v39 = vadd.f32 1.0, %v2629_v18 }
 0x31a   :  { %2634 = vrcp.f32 %v1772_v50 }
 0x31b   :  { %v2631_v16 = vpop.eup %2630  ;;  %2636 = vrcp.f32 %v1773_v39 }
 0x31c   :  { %v2633_v51 = vpop.eup %2632  ;;  %v1779_v52 = vadd.f32 1.0, %v2631_v16 }
 0x31d   :  { %v1780_v53 = vadd.f32 1.0, %v2633_v51 }
 0x31e   :  { %2638 = vrcp.f32 %v1779_v52 }
 0x31f   :  { %2640 = vrcp.f32 %v1780_v53 }
 0x324   :  { %v2635_v6 = vpop.eup %2634 }
 0x325   :  { %v2637_v38 = vpop.eup %2636  ;;  %1814 = vst [vmem:[#allocation11 + $0x20] sm:$0xff] %v2635_v6 }
 0x326   :  { %1815 = vst [vmem:[#allocation11 + $0x28] sm:$0xff] %v2637_v38 }
 0x328   :  { %v2639_v55 = vpop.eup %2638 }
 0x329   :  { %v2641_v56 = vpop.eup %2640  ;;  %1821 = vst [vmem:[#allocation11 + $0x58] sm:$0xff] %v2639_v55 }
 0x32a   :  { %1822 = vst [vmem:[#allocation11 + $0x60] sm:$0xff] %v2641_v56 }
 0x32b   :  { %2763 = shalt.err (!%p2760_p2)
}
 0x32c   :  { %s2764_s10 = scalar_lea.hbm %s3033_s5, 1792 }
 0x32d   :  { %p2765_p3 = scmp.ne.s32.totalorder %s3033_s5, %s2764_s10  ;;  %p2768_p4 = scmp.lt.u32.totalorder %s2764_s10, %s3033_s5 }
 0x32f   :  { %p2770_p5 = pnand %p2768_p4, %p2765_p3 }
 0x331   :  { %2773 = shalt.err (!%p2770_p5)
}
 0x332   :  { %1835 = dma.vmem_to_hbm [thread:$0]  %s1830_s6, 1792, %s3033_s5, [#allocation4], %s2786_s1, %s2786_s1, %s2787_s17  }
 0x333   :  { %2780 = dma.done.wait [#allocation4], 1792  }
 0x334   :  { %2781 = vsyncadd [#allocation4], 4294965504 }
 0x335   :  { %1839 = vsyncpa [#allocation3], 1 }
 0x336   :  { %1840 = vsyncpa [#allocation6], 1 }
 0x337   :  { %1841 = vsyncpa [#allocation9], 1 }
 0x338   :  { %1842 = vsyncpa [#allocation4], 1 }

</bundles_post_ra>
